<compile_context>
chip_gen: v6e
topology: v6e:2x2x1
jax: 0.10.0
libtpu: 0.0.40
codegen_flags: <defaults>
</compile_context>

<pallas_src>
import jax
import jax.numpy as jnp
import numpy as np
from jax.experimental import pallas as pl
from jax.experimental.pallas import tpu as pltpu


def siren_kernel(x_ref, w0_ref, b0_ref, w1_ref, b1_ref, wl_ref, bl_ref, o_ref):
    """One column-tile (lane-dense batch) of the full SIREN MLP: 2 sine layers + linear head.

    x_ref: (D_in, TN), w*_ref: (out, in), b*_ref: (out, 1), o_ref: (D_out, TN).
    omega is already folded into w0/b0/w1/b1.
    """
    h = x_ref[...]  # (D_in, TN) f32, batch on lanes

    # SinLayer 0: sin((omega*W0) @ h + omega*b0)
    h = jnp.sin(jnp.dot(w0_ref[...], h, preferred_element_type=jnp.float32) + b0_ref[...])

    # SinLayer 1: sin((omega*W1) @ h + omega*b1)
    h = jnp.sin(jnp.dot(w1_ref[...], h, preferred_element_type=jnp.float32) + b1_ref[...])

    # Last LinearLayer (activation='none'); lane-dense (D_out, TN) store.
    o_ref[...] = jnp.dot(wl_ref[...], h, preferred_element_type=jnp.float32) + bl_ref[...]


def _choose_tile_n(n):
    """Largest lane-dense tile that still gives >= 2 grid steps (v7x has 2 TCs)."""
    for t in (2048, 1024, 512, 256, 128):
        if n >= 2 * t:
            return t
    return 128


def siren_forward(x, params, *, omega, tile_n=None, vmem_limit_bytes=32 * 1024 * 1024):
    """x: (N, D_in) f32.  params: PyTorch-layout weights (out, in) and biases (out,)."""
    N, D_in = x.shape
    w0, b0 = params["w0"], params["b0"]
    w1, b1 = params["w1"], params["b1"]
    wl, bl = params["wl"], params["bl"]
    D_out = wl.shape[0]

    if tile_n is None:
        tile_n = _choose_tile_n(N)
    n_pad = pl.cdiv(N, tile_n) * tile_n

    # Wrapper-side transpose + zero-pad so the batch dim is lane-dense and any N works.
    xt = x.T  # (D_in, N)
    if n_pad != N:
        xt = jnp.pad(xt, ((0, 0), (0, n_pad - N)))

    # Fold omega into the sine-layer weights/biases (one-time O(weights) rescale).
    w0s = (omega * w0).astype(jnp.float32)
    b0s = (omega * b0).reshape(-1, 1).astype(jnp.float32)
    w1s = (omega * w1).astype(jnp.float32)
    b1s = (omega * b1).reshape(-1, 1).astype(jnp.float32)
    wlc = wl.astype(jnp.float32)
    blc = bl.reshape(-1, 1).astype(jnp.float32)

    full = lambda i: (0, 0)  # weights/biases: single block, resident across grid steps

    out_t = pl.pallas_call(
        siren_kernel,
        out_shape=jax.ShapeDtypeStruct((D_out, n_pad), jnp.float32),
        grid_spec=pltpu.PrefetchScalarGridSpec(
            num_scalar_prefetch=0,
            grid=(n_pad // tile_n,),
            in_specs=[
                pl.BlockSpec((D_in, tile_n), lambda i: (0, i)),
                pl.BlockSpec(w0s.shape, full),
                pl.BlockSpec(b0s.shape, full),
                pl.BlockSpec(w1s.shape, full),
                pl.BlockSpec(b1s.shape, full),
                pl.BlockSpec(wlc.shape, full),
                pl.BlockSpec(blc.shape, full),
            ],
            out_specs=pl.BlockSpec((D_out, tile_n), lambda i: (0, i)),
        ),
        compiler_params=pltpu.CompilerParams(
            dimension_semantics=("parallel",),
            vmem_limit_bytes=vmem_limit_bytes,
        ),
    )(xt, w0s, b0s, w1s, b1s, wlc, blc)

    # Back to the PyTorch (N, D_out) layout, dropping the padded tail.
    return out_t[:, :N].T


def init_siren_params(key, layers, omega):
    """Deterministic SIREN-style init, PyTorch nn.Linear layout: W (out, in), b (out,).

    SinLayer i (is_first = i == 0):
      W ~ U(-1/fan_in, 1/fan_in)              if first layer
      W ~ U(-sqrt(6/fan_in)/omega, +...)      otherwise
    Last LinearLayer: PyTorch default U(-1/sqrt(fan_in), +1/sqrt(fan_in)).
    """
    n_layers = len(layers) - 1
    keys = jax.random.split(key, 2 * n_layers)
    params = {}
    for i in range(n_layers - 1):
        fan_in, fan_out = layers[i], layers[i + 1]
        bound = (1.0 / fan_in) if i == 0 else (np.sqrt(6.0 / fan_in) / omega)
        params[f"w{i}"] = jax.random.uniform(
            keys[2 * i], (fan_out, fan_in), jnp.float32, -bound, bound)
        params[f"b{i}"] = jax.random.uniform(
            keys[2 * i + 1], (fan_out,), jnp.float32, -bound, bound)
    fan_in, fan_out = layers[-2], layers[-1]
    bound = 1.0 / np.sqrt(fan_in)
    params["wl"] = jax.random.uniform(keys[-2], (fan_out, fan_in), jnp.float32, -bound, bound)
    params["bl"] = jax.random.uniform(keys[-1], (fan_out,), jnp.float32, -bound, bound)
    return params


def siren_reference(x, params, omega):
    """Pure-JAX reference matching the PyTorch forward (row-major, unscaled weights)."""
    h = jnp.sin(omega * (x @ params["w0"].T + params["b0"]))
    h = jnp.sin(omega * (h @ params["w1"].T + params["b1"]))
    return h @ params["wl"].T + params["bl"]


if __name__ == "__main__":
    # layers = [2, 32, 32, 1]  (coordinate MLP: 2-D coords -> scalar), omega = 10
    layers = [2, 32, 32, 1]
    omega = 10.0
    N = 300  # non-multiple of the tile to exercise the pad/slice path (3 grid steps of 128)

    key = jax.random.PRNGKey(0)
    k_params, k_x = jax.random.split(key)
    params = init_siren_params(k_params, layers, omega)

    # coordinates in [-1, 1], shape (N, 2)
    x = jax.random.uniform(k_x, (N, layers[0]), jnp.float32, -1.0, 1.0)
    # encoder_input is unused for modulation_type='none' / encoder_type='none'
    # TODO(synk): encoder / modulation branches (AE, AE_better, VGG, *AM, QAM, attention,
    # SIREN+) are not exercised by the default config and are not implemented here.

    out = siren_forward(x, params, omega=omega)
    out = jax.block_until_ready(out)

    ref = siren_reference(x, params, omega)
    np.testing.assert_allclose(np.asarray(out), np.asarray(ref), rtol=1e-5, atol=1e-5)
    assert out.shape == (N, layers[-1])

    print("KERNEL_OK")
</pallas_src>

<mosaic_0001>
module attributes {stable_mosaic.version = 11 : i64} {
  func.func @siren_kernel(%arg0: i32, %arg1: memref<2x128xf32, #tpu.memory_space<vmem>>, %arg2: memref<32x2xf32, #tpu.memory_space<vmem>>, %arg3: memref<32x1xf32, #tpu.memory_space<vmem>>, %arg4: memref<32x32xf32, #tpu.memory_space<vmem>>, %arg5: memref<32x1xf32, #tpu.memory_space<vmem>>, %arg6: memref<1x32xf32, #tpu.memory_space<vmem>>, %arg7: memref<1x1xf32, #tpu.memory_space<vmem>>, %arg8: memref<1x128xf32, #tpu.memory_space<vmem>>) attributes {dimension_semantics = [#tpu.dimension_semantics<parallel>], iteration_bounds = array<i64: 3>, scalar_prefetch = 0 : i64, scratch_operands = 0 : i64, tpu.core_type = #tpu.core_type<tc>, window_params = [{transform_indices = @transform_0, window_bounds = array<i64: 2, 128>}, {pipeline_mode = #tpu.pipeline_mode<synchronous>, transform_indices = @transform_1, window_bounds = array<i64: 32, 2>}, {pipeline_mode = #tpu.pipeline_mode<synchronous>, transform_indices = @transform_2, window_bounds = array<i64: 32, 1>}, {pipeline_mode = #tpu.pipeline_mode<synchronous>, transform_indices = @transform_3, window_bounds = array<i64: 32, 32>}, {pipeline_mode = #tpu.pipeline_mode<synchronous>, transform_indices = @transform_4, window_bounds = array<i64: 32, 1>}, {pipeline_mode = #tpu.pipeline_mode<synchronous>, transform_indices = @transform_5, window_bounds = array<i64: 1, 32>}, {pipeline_mode = #tpu.pipeline_mode<synchronous>, transform_indices = @transform_6, window_bounds = array<i64: 1, 1>}, {transform_indices = @transform_7, window_bounds = array<i64: 1, 128>}]} {
    %c0 = arith.constant 0 : index
    %c0_0 = arith.constant 0 : index
    %0 = vector.load %arg1[%c0, %c0_0] : memref<2x128xf32, #tpu.memory_space<vmem>>, vector<2x128xf32>
    %c0_1 = arith.constant 0 : index
    %c0_2 = arith.constant 0 : index
    %1 = vector.load %arg2[%c0_1, %c0_2] : memref<32x2xf32, #tpu.memory_space<vmem>>, vector<32x2xf32>
    %cst = arith.constant dense<0.000000e+00> : vector<32x128xf32>
    %2 = tpu.matmul %1, %0, %cst {dimension_numbers = #tpu.dot_dimension_numbers<[1], [0], [0], [1], [0, 0, 1, 1], [], []>} : vector<32x2xf32>, vector<2x128xf32>, vector<32x128xf32> -> vector<32x128xf32>
    %c0_3 = arith.constant 0 : index
    %c0_4 = arith.constant 0 : index
    %3 = vector.load %arg3[%c0_3, %c0_4] : memref<32x1xf32, #tpu.memory_space<vmem>>, vector<32x1xf32>
    %4 = vector.broadcast %3 : vector<32x1xf32> to vector<32x128xf32>
    %5 = arith.addf %2, %4 : vector<32x128xf32>
    %6 = math.sin %5 : vector<32x128xf32>
    %c0_5 = arith.constant 0 : index
    %c0_6 = arith.constant 0 : index
    %7 = vector.load %arg4[%c0_5, %c0_6] : memref<32x32xf32, #tpu.memory_space<vmem>>, vector<32x32xf32>
    %cst_7 = arith.constant dense<0.000000e+00> : vector<32x128xf32>
    %8 = tpu.matmul %7, %6, %cst_7 {dimension_numbers = #tpu.dot_dimension_numbers<[1], [0], [0], [1], [0, 0, 1, 1], [], []>} : vector<32x32xf32>, vector<32x128xf32>, vector<32x128xf32> -> vector<32x128xf32>
    %c0_8 = arith.constant 0 : index
    %c0_9 = arith.constant 0 : index
    %9 = vector.load %arg5[%c0_8, %c0_9] : memref<32x1xf32, #tpu.memory_space<vmem>>, vector<32x1xf32>
    %10 = vector.broadcast %9 : vector<32x1xf32> to vector<32x128xf32>
    %11 = arith.addf %8, %10 : vector<32x128xf32>
    %12 = math.sin %11 : vector<32x128xf32>
    %c0_10 = arith.constant 0 : index
    %c0_11 = arith.constant 0 : index
    %13 = vector.load %arg6[%c0_10, %c0_11] : memref<1x32xf32, #tpu.memory_space<vmem>>, vector<1x32xf32>
    %cst_12 = arith.constant dense<0.000000e+00> : vector<1x128xf32>
    %14 = tpu.matmul %13, %12, %cst_12 {dimension_numbers = #tpu.dot_dimension_numbers<[1], [0], [0], [1], [0, 0, 1, 1], [], []>} : vector<1x32xf32>, vector<32x128xf32>, vector<1x128xf32> -> vector<1x128xf32>
    %c0_13 = arith.constant 0 : index
    %c0_14 = arith.constant 0 : index
    %15 = vector.load %arg7[%c0_13, %c0_14] : memref<1x1xf32, #tpu.memory_space<vmem>>, vector<1x1xf32>
    %16 = vector.broadcast %15 : vector<1x1xf32> to vector<1x128xf32>
    %17 = arith.addf %14, %16 : vector<1x128xf32>
    %c0_15 = arith.constant 0 : index
    %c0_16 = arith.constant 0 : index
    %18 = vector.load %arg8[%c0_15, %c0_16] : memref<1x128xf32, #tpu.memory_space<vmem>>, vector<1x128xf32>
    tpu.vector_store %arg8[%c0_15, %c0_16], %17 {strides = array<i32>} : memref<1x128xf32, #tpu.memory_space<vmem>>, vector<1x128xf32>,
    return
  }
  func.func @transform_0(%arg0: i32) -> (i32, i32) {
    %c0_i32 = arith.constant 0 : i32
    %c0_i32_0 = arith.constant 0 : i32
    return %c0_i32, %arg0 : i32, i32
  }
  func.func @transform_1(%arg0: i32) -> (i32, i32) {
    %c0_i32 = arith.constant 0 : i32
    %c0_i32_0 = arith.constant 0 : i32
    %c0_i32_1 = arith.constant 0 : i32
    return %c0_i32, %c0_i32_0 : i32, i32
  }
  func.func @transform_2(%arg0: i32) -> (i32, i32) {
    %c0_i32 = arith.constant 0 : i32
    %c0_i32_0 = arith.constant 0 : i32
    %c0_i32_1 = arith.constant 0 : i32
    return %c0_i32, %c0_i32_0 : i32, i32
  }
  func.func @transform_3(%arg0: i32) -> (i32, i32) {
    %c0_i32 = arith.constant 0 : i32
    %c0_i32_0 = arith.constant 0 : i32
    %c0_i32_1 = arith.constant 0 : i32
    return %c0_i32, %c0_i32_0 : i32, i32
  }
  func.func @transform_4(%arg0: i32) -> (i32, i32) {
    %c0_i32 = arith.constant 0 : i32
    %c0_i32_0 = arith.constant 0 : i32
    %c0_i32_1 = arith.constant 0 : i32
    return %c0_i32, %c0_i32_0 : i32, i32
  }
  func.func @transform_5(%arg0: i32) -> (i32, i32) {
    %c0_i32 = arith.constant 0 : i32
    %c0_i32_0 = arith.constant 0 : i32
    %c0_i32_1 = arith.constant 0 : i32
    return %c0_i32, %c0_i32_0 : i32, i32
  }
  func.func @transform_6(%arg0: i32) -> (i32, i32) {
    %c0_i32 = arith.constant 0 : i32
    %c0_i32_0 = arith.constant 0 : i32
    %c0_i32_1 = arith.constant 0 : i32
    return %c0_i32, %c0_i32_0 : i32, i32
  }
  func.func @transform_7(%arg0: i32) -> (i32, i32) {
    %c0_i32 = arith.constant 0 : i32
    %c0_i32_0 = arith.constant 0 : i32
    return %c0_i32, %arg0 : i32, i32
  }
}

</mosaic_0001>

<bundles_post_ra>
// kernel: tpu_custom_call.1
= control target key start
LH: loop header
LB: loop body
LE: loop exit
PB: predicated region body
PF: predicated region fallthrough
CT: control target
= control target key end

     0   :  { %s2545_s0 = inlined_call_operand.vmem [shape: f32[2,384], index: 0, kind: input, shape index: {}]   ;;  %s2546_s1 = inlined_call_operand.vmem [shape: f32[32,2], index: 1, kind: input, shape index: {}]   ;;  %s2547_s2 = inlined_call_operand.vmem [shape: f32[32,1], index: 2, kind: input, shape index: {}]   ;;  %s2548_s3 = inlined_call_operand.vmem [shape: f32[32,32], index: 3, kind: input, shape index: {}]   ;;  %s2549_s4 = inlined_call_operand.vmem [shape: f32[32,1], index: 4, kind: input, shape index: {}]   ;;  %s2550_s5 = inlined_call_operand.vmem [shape: f32[1,32], index: 5, kind: input, shape index: {}]   ;;  %s2551_s6 = inlined_call_operand.<no memory space> [shape: f32[1,1], index: 6, kind: input, shape index: {}]   ;;  %s2552_s7 = inlined_call_operand.hbm [shape: f32[1,384], index: 7, kind: output, shape index: {}]  }
   0x1   :  { %v12_v0 = vstv %s2551_s6 }
   0x2   :  { %13 = vst [vmem:[#allocation2] sm:$0x1] %v12_v0 }
   0x3   :  { %14 = vsyncpa [#allocation4], 0 }
   0x4   :  { %16 = vsyncpa [#allocation4 + $0x1], 0  ;;  %s1847_s26 = smov 0   ;;  %s1849_s27 = smov 0  }
   0x5   :  { %s1851_s28 = smov 0   ;;  %s1853_s29 = smov 0  }
   0x6 LB: > { %s1868_s6 = sadd.s32 4294967295, %s1792_s29   ;;  %s1517_s30 = sadd.s32 4294967294, %s1792_s29   ;;  %s1792_s29 = sphi %s1853_s29, %s2574_s29   ;;  %s1788_s28 = sphi %s1851_s28, %s2573_s28   ;;  %s1784_s27 = sphi %s1849_s27, %s2572_s27   ;;  %s1780_s26 = sphi %s1847_s26, %s2571_s26  }
   0x7   : > { %s1872_s8 = sadd.s32 1, %s1792_s29   ;;  %s181_s9 = sadd.s32 1, %s1788_s28 }
   0x8   : > { %s178_s10 = ssub.s32 %s1792_s29, %s1872_s8  ;;  %p191_p0 = scmp.ne.s32.totalorder %s1788_s28, %s1784_s27 }
   0x9   : > { %p179_p1 = scmp.eq.s32.totalorder %s178_s10, 0  ;;  %p192_p2 = scmp.eq.s32.totalorder %s1868_s6, 2 }
   0xa   : > { %p197_p3 = scmp.ne.s32.totalorder %s1784_s27, %s1780_s26  ;;  %p198_p4 = scmp.eq.s32.totalorder %s1517_s30, 2 }
   0xb   : > { %s1883_s11 = scalar_select %p179_p1, %s1788_s28, %s181_s9  }
   0xc   : > { %p1885_p5 = por %p192_p2, %p191_p0  ;;  %p1889_p6 = por %p198_p4, %p197_p3 }
   0xd   : > { %p1520_p7 = scmp.ge.s32.totalorder %s1792_s29, 1  ;;  %p241_p8 = scmp.lt.s32.totalorder %s1792_s29, 4 }
   0xf   : > { %p242_p9 = pnand %p1520_p7, %p241_p8 }
  0x10   : > { %p271_p10 = scmp.lt.s32.totalorder (!%p242_p9), %s1868_s6, 2  ;;  %s269_s23 = sand.u32 (!%p242_p9), 1, %s1784_s27  }
  0x11   : > { %245 = sbr.rel (%p242_p9) target bundleno = 888 (0x378), region = 48  ;;  %s1564_s24 = sshll.u32 (!%p242_p9), %s1868_s6, 4 }
  0x12   : > { %s270_s25 = scalar_lea.vmem (!%p242_p9), [#allocation3], %s269_s23  ;;  %s2510_s14 = scalar_lea.hbm (!%p242_p9), %s2552_s7, %s1564_s24 }
  0x13   : > { %s1450_s15 = scalar_lea.sflag (!%p242_p9), [#allocation4], %s269_s23 }
  0x16   : > { %v276_v1 = vld [vmem:[%s2546_s1] sm:$0xff]  ;;  %vm304_vm0 = vcmask 15360   ;;  %v283_v2 = vld [vmem:[%s2547_s2 + $0x18] sm:$0xff]  ;;  %s272_s18 = scalar_select %p271_p10, %s1868_s6, 2  ;;  %v1794_v3 = vmov 0   ;;  %v281_v4 = vld [vmem:[%s2547_s2 + $0x8] sm:$0xff] }
  0x17   : > { %1587 = vmatprep.mubr.msk.f32.mxu0 %vm304_vm0, %v276_v1  ;;  %1698 = vset.pattern.permute.xlu0 %v1794_v3  ;;  %vm317_vm1 = vcmask 1041408   ;;  %v282_v5 = vld [vmem:[%s2547_s2 + $0x10] sm:$0xff]  ;;  %v280_v6 = vld [vmem:[%s2547_s2] sm:$0xff]  ;;  %v277_v8 = vld [vmem:[%s2546_s1 + $0x8] sm:$0xff]  ;;  %v1795_v52 = vmov 683565275  }
  0x18   : > { %1699 = vset.pattern.permute.xlu1 %v1794_v3  ;;  %301 = vperm.xlu0 %1698, %v283_v2   ;;  %s1521_s21 = sshll.u32 %s272_s18, 1  ;;  %v278_v9 = vld [vmem:[%s2546_s1 + $0x10] sm:$0xff]  ;;  %v829_v10 = vld [vmem:[%s2549_s4 + $0x18] sm:$0xff]  ;;  %v827_v13 = vld [vmem:[%s2549_s4 + $0x8] sm:$0xff]  ;;  %v1796_v55 = vmov 2475754826  }
  0x19   : > { %291 = vperm.xlu1 %1699, %v281_v4   ;;  %s274_s30 = scalar_lea.vmem %s2545_s0, %s1521_s21  ;;  %v828_v11 = vld [vmem:[%s2549_s4 + $0x10] sm:$0xff]  ;;  %v279_v12 = vld [vmem:[%s2546_s1 + $0x18] sm:$0xff]  ;;  %v826_v14 = vld [vmem:[%s2549_s4] sm:$0xff]  ;;  %v1797_v57 = vmov 2131351028   ;;  %s1803_s6 = smov [#allocation3]  }
  0x1a   : > { %v275_v7 = vld [vmem:[%s274_s30] sm:$0x3]  ;;  %v1798_v59 = vmov 2102212464   ;;  %v1799_v61 = vmov 920167782  }
  0x1b   : > { %1585 = vmatprep.subr.msk.mxu0 %vm317_vm1, %v275_v7  ;;  %v1365_v15 = vld [vmem:[#allocation2] sm:$0x1]  ;;  %v1800_v4 = vmov 1326507024   ;;  %s1462_s30 = sshll.u32 %s270_s25, 4  ;;  %s1736_s17 = sshll.u32 %s1803_s6, 4  ;;  %s1463_s30 = int_to_ptr.vmem [resolvable:$true] %s1462_s30  ;;  %s1737_s17 = int_to_ptr.vmem [resolvable:$false] %s1736_s17 }
  0x1c   : > { %296 = vperm.xlu0 %1698, %v282_v5   ;;  %1586 = vmatpush3.msk.msra.mxu0 %vm317_vm1, %v275_v7  ;;  %s1732_s16 = scalar_lea.vmem %s1463_s30, 16  ;;  %s1738_s18 = scalar_lea.vmem %s1737_s17, 32 }
  0x1d   : > { %286 = vperm.xlu1 %1699, %v280_v6   ;;  %1588 = vmatmul.mubr.msk.f32.vlgmr.msra.gmra.mxu0 %vm304_vm0, %v277_v8  ;;  %p1733_p11 = scmp.ne.s32.totalorder %s1463_s30, %s1732_s16  ;;  %p1739_p0 = scmp.lt.s32.totalorder %s1463_s30, %s1737_s17 }
  0x1e   : > { %1590 = vmatprep.mubr.msk.f32.mxu0 %vm304_vm0, %v278_v9  ;;  %p1740_p1 = scmp.lt.s32.totalorder %s1738_s18, %s1732_s16 }
  0x1f   : > { %p1734_p12 = pnand %p1733_p11, %p1885_p5 }
  0x20   : > { %847 = vperm.xlu0 %1698, %v829_v10   ;;  %p1741_p2 = por %p1740_p1, %p1739_p0 }
  0x21   : > { %842 = vperm.xlu1 %1699, %v828_v11   ;;  %1591 = vmatmul.mubr.msk.f32.gmra.mxu0 %vm304_vm0, %v279_v12  ;;  %p1735_p13 = pneg %p1734_p12 }
  0x23   : > { %p1742_p3 = pnand %p1741_p2, %p1735_p13 }
  0x24   : > { %837 = vperm.xlu0 %1698, %v827_v13  }
  0x25   : > { %832 = vperm.xlu1 %1699, %v826_v14  }
  0x28   : > { %1368 = vperm.xlu0 %1698, %v1365_v15  }
  0x93   : > { %v302_v17 = vpop.permute.xlu0 %301 }
  0x94   : > { %v292_v16 = vpop.permute.xlu1 %291 }
  0x97   : > { %v297_v28 = vpop.permute.xlu0 %296 }
  0x98   : > { %v287_v20 = vpop.permute.xlu1 %286 }
  0xdd   : > { %v1589_v18 = vpop.f32.mrf.mxu0 }
  0xde   : > { %v1940_v19 = vadd.f32 %v1589_v18, %v292_v16 }
  0xdf   : > { %v387_v21 = vpop.f32.mrf.mxu0 }
  0xe0   : > { %v510_v22 = vand.u32 2147483647, %v1940_v19  ;;  %v513_v23 = vand.u32 2139095040, %v1940_v19  ;;  %v1944_v24 = vadd.f32 %v387_v21, %v287_v20 }
  0xe1   : > { %v1592_v25 = vpop.f32.mrf.mxu0 }
  0xe2   : > { %v514_v26 = vshrl.u32 %v513_v23, 23  ;;  %v406_v27 = vand.u32 2147483647, %v1944_v24  ;;  %v517_v29 = vand.u32 8388607, %v510_v22  ;;  %v409_v30 = vand.u32 2139095040, %v1944_v24 }
  0xe3   : > { %v1950_v31 = vadd.f32 %v1592_v25, %v302_v17  ;;  %v397_v32 = vpop.f32.mrf.mxu0 }
  0xe4   : > { %v1531_v33 = vadd.s32 4294967169, %v514_v26  ;;  %v413_v34 = vand.u32 8388607, %v406_v27  ;;  %v1954_v35 = vadd.f32 %v397_v32, %v297_v28  ;;  %v410_v36 = vshrl.u32 %v409_v30, 23 }
  0xe5   : > { %v721_v37 = vand.u32 2139095040, %v1950_v31  ;;  %v518_v39 = vor.u32 8388608, %v517_v29 }
  0xe6   : > { %v520_v38 = vadd.s32 1, %v1531_v33  ;;  %v1527_v40 = vadd.s32 4294967169, %v410_v36  ;;  %v414_v41 = vor.u32 8388608, %v413_v34  ;;  %v617_v43 = vand.u32 2139095040, %v1954_v35 }
  0xe7   : > { %v722_v42 = vshrl.u32 %v721_v37, 23  ;;  %v1958_v48 = vshll.u32 %v518_v39, 8 }
  0xe8   : > { %vm521_vm2 = vcmp.gt.s32.totalorder %v520_v38, 0  ;;  %v416_v45 = vadd.s32 1, %v1527_v40  ;;  %v1960_v49 = vshll.u32 %v414_v41, 8  ;;  %v1963_v54 = vshrl.u32 %v617_v43, 23 }
  0xe9   : > { %v522_v44 = vsel %vm521_vm2, %v520_v38, 0  ;;  %v1539_v50 = vadd.s32 4294967169, %v722_v42 }
  0xea   : > { %v523_v46 = vshrl.u32 %v522_v44, 5  ;;  %v524_v47 = vand.u32 31, %v522_v44  ;;  %vm417_vm3 = vcmp.gt.s32.totalorder %v416_v45, 0 }
  0xeb   : > { %v418_v9 = vsel %vm417_vm3, %v416_v45, 0  ;;  %v728_v26 = vadd.s32 1, %v1539_v50 }
  0xec   : > { %v525_v51 = vsub.s32 32, %v524_v47  ;;  %v527_v53 = vshll.u32 %v1795_v52, %v524_v47  ;;  %v530_v56 = vshll.u32 %v1796_v55, %v524_v47  ;;  %v533_v58 = vshll.u32 %v1797_v57, %v524_v47 }
  0xed   : > { %v536_v60 = vshll.u32 %v1798_v59, %v524_v47  ;;  %v539_v62 = vshll.u32 %v1799_v61, %v524_v47  ;;  %vm542_vm4 = vcmp.lt.s32.totalorder %v523_v46, 1  ;;  %vm544_vm5 = vcmp.lt.s32.totalorder %v523_v46, 3 }
  0xee   : > { %v528_v63 = vshrl.u32 %v1796_v55, %v525_v51  ;;  %v531_v0 = vshrl.u32 %v1797_v57, %v525_v51  ;;  %v534_v1 = vshrl.u32 %v1798_v59, %v525_v51  ;;  %v526_v2 = vshrl.u32 %v1795_v52, %v525_v51 }
  0xef   : > { %v537_v3 = vshrl.u32 %v1799_v61, %v525_v51  ;;  %v540_v5 = vshrl.u32 %v1800_v4, %v525_v51  ;;  %vm545_vm6 = vcmp.lt.s32.totalorder %v523_v46, 4  ;;  %v420_v12 = vand.u32 31, %v418_v9 }
  0xf0   : > { %v529_v6 = vor.u32 %v528_v63, %v527_v53  ;;  %v532_v7 = vor.u32 %v531_v0, %v530_v56  ;;  %v535_v8 = vor.u32 %v534_v1, %v533_v58  ;;  %vm543_vm7 = vcmp.lt.s32.totalorder %v523_v46, 2 }
  0xf1   : > { %v538_v10 = vor.u32 %v537_v3, %v536_v60  ;;  %v541_v11 = vor.u32 %v540_v5, %v539_v62  ;;  %v421_v21 = vsub.s32 32, %v420_v12  ;;  %v419_v32 = vshrl.u32 %v418_v9, 5 }
  0xf2   : > { %v546_v13 = vsel %vm542_vm4, %v526_v2, %v529_v6  ;;  %v547_v14 = vsel %vm545_vm6, %v535_v8, 2102212464  ;;  %v550_v15 = vsel %vm542_vm4, %v529_v6, %v532_v7  ;;  %v554_v16 = vsel %vm542_vm4, %v532_v7, %v535_v8 }
  0xf3   : > { %v548_v17 = vsel %vm544_vm5, %v532_v7, %v547_v14  ;;  %v551_v18 = vsel %vm545_vm6, %v538_v10, 920167782  ;;  %v555_v20 = vsel %vm545_vm6, %v541_v11, 1326507024  ;;  %v423_v38 = vshll.u32 %v1795_v52, %v420_v12 }
  0xf4   : > { %v552_v23 = vsel %vm544_vm5, %v535_v8, %v551_v18  ;;  %v556_v25 = vsel %vm544_vm5, %v538_v10, %v555_v20  ;;  %v549_v28 = vsel %vm543_vm7, %v546_v13, %v548_v17  ;;  %v424_v39 = vshrl.u32 %v1796_v55, %v421_v21 }
  0xf5   : > { %v553_v29 = vsel %vm543_vm7, %v550_v15, %v552_v23  ;;  %v557_v30 = vsel %vm543_vm7, %v554_v16, %v556_v25  ;;  %v426_v40 = vshll.u32 %v1796_v55, %v420_v12  ;;  %v427_v41 = vshrl.u32 %v1797_v57, %v421_v21 }
  0xf6   : > { %v1983_v33 = vmul.u32.u64.low %v1958_v48, %v557_v30  ;;  %v1984_v34 = vmul.u32.u64.high %v1958_v48, %v557_v30, %v1983_v33  ;;  %v1987_v36 = vmul.u32.u64.low %v1958_v48, %v553_v29  ;;  %v1988_v37 = vmul.u32.u64.high %v1958_v48, %v553_v29, %v1987_v36 }
  0xf7   : > { %v429_v42 = vshll.u32 %v1797_v57, %v420_v12  ;;  %v430_v43 = vshrl.u32 %v1798_v59, %v421_v21  ;;  %v432_v44 = vshll.u32 %v1798_v59, %v420_v12  ;;  %v433_v45 = vshrl.u32 %v1799_v61, %v421_v21 }
  0xf8   : > { %v425_v46 = vor.u32 %v424_v39, %v423_v38  ;;  %v428_v47 = vor.u32 %v427_v41, %v426_v40  ;;  %v435_v50 = vshll.u32 %v1799_v61, %v420_v12  ;;  %v436_v51 = vshrl.u32 %v1800_v4, %v421_v21 }
  0xf9   : > { %v565_v53 = vmul.u32 %v1958_v48, %v549_v28  ;;  %vm567_vm8 = vc.u32 %v1984_v34, %v1987_v36  ;;  %v568_v56 = vadd.s32 1, %v1988_v37  ;;  %v431_v58 = vor.u32 %v430_v43, %v429_v42 }
  0xfa   : > { %v422_v60 = vshrl.u32 %v1795_v52, %v421_v21  ;;  %v434_v62 = vor.u32 %v433_v45, %v432_v44  ;;  %v437_v63 = vor.u32 %v436_v51, %v435_v50  ;;  %vm438_vm9 = vcmp.lt.s32.totalorder %v419_v32, 1 }
  0xfb   : > { %v569_v0 = vsel %vm567_vm8, %v568_v56, %v1988_v37  ;;  %vm440_vm10 = vcmp.lt.s32.totalorder %v419_v32, 3  ;;  %vm441_vm11 = vcmp.lt.s32.totalorder %v419_v32, 4  ;;  %v446_v1 = vsel %vm438_vm9, %v425_v46, %v428_v47 }
  0xfc   : > { %v570_v2 = vadd.s32 %v569_v0, %v565_v53  ;;  %v443_v3 = vsel %vm441_vm11, %v431_v58, 2102212464  ;;  %v447_v5 = vsel %vm441_vm11, %v434_v62, 920167782  ;;  %v450_v48 = vsel %vm438_vm9, %v428_v47, %v431_v58 }
  0xfd   : > { %vm439_vm12 = vcmp.lt.s32.totalorder %v419_v32, 2  ;;  %v448_v6 = vsel %vm440_vm10, %v431_v58, %v447_v5  ;;  %v451_v7 = vsel %vm441_vm11, %v437_v63, 1326507024  ;;  %v1535_v8 = vadd.s32 4294967169, %v1963_v54 }
  0xfe   : > { %v442_v9 = vsel %vm438_vm9, %v422_v60, %v425_v46  ;;  %v444_v10 = vsel %vm440_vm10, %v428_v47, %v443_v3  ;;  %v449_v11 = vsel %vm439_vm12, %v446_v1, %v448_v6  ;;  %v452_v12 = vsel %vm440_vm10, %v434_v62, %v451_v7 }
  0xff   : > { %v453_v13 = vsel %vm439_vm12, %v450_v48, %v452_v12  ;;  %v2009_v14 = vmul.u32.u64.low %v1960_v49, %v449_v11  ;;  %v2010_v15 = vmul.u32.u64.high %v1960_v49, %v449_v11, %v2009_v14  ;;  %vm729_vm13 = vcmp.gt.s32.totalorder %v728_v26, 0 }
 0x100   : > { %v571_v16 = vadd.s32 536870912, %v570_v2  ;;  %v2014_v17 = vmul.u32.u64.low %v1960_v49, %v453_v13  ;;  %v2015_v18 = vmul.u32.u64.high %v1960_v49, %v453_v13, %v2014_v17  ;;  %v445_v20 = vsel %vm439_vm12, %v442_v9, %v444_v10 }
 0x101   : > { %v624_v21 = vadd.s32 1, %v1535_v8  ;;  %v730_v23 = vsel %vm729_vm13, %v728_v26, 0  ;;  %v464_v54 = vadd.s32 1, %v2010_v15  ;;  %v461_v28 = vmul.u32 %v1960_v49, %v445_v20 }
 0x102   : > { %v2018_v25 = vshrl.u32 %v571_v16, 30  ;;  %vm463_vm14 = vc.u32 %v2015_v18, %v2009_v14  ;;  %v614_v29 = vand.u32 2147483647, %v1954_v35  ;;  %v2025_v32 = vand.u32 31, %v730_v23 }
 0x103   : > { %v465_v30 = vsel %vm463_vm14, %v464_v54, %v2010_v15  ;;  %vm625_vm15 = vcmp.gt.s32.totalorder %v624_v21, 0  ;;  %v718_v45 = vand.u32 2147483647, %v1950_v31  ;;  %v2051_v6 = vshrl.u32 %v730_v23, 5 }
 0x104   : > { %v466_v33 = vadd.s32 %v465_v30, %v461_v28  ;;  %v626_v37 = vsel %vm625_vm15, %v624_v21, 0  ;;  %v573_v26 = vshll.u32 %v2018_v25, 30  ;;  %v621_v40 = vand.u32 8388607, %v614_v29 }
 0x105   : > { %v628_v38 = vand.u32 31, %v626_v37  ;;  %v2031_v49 = vsub.s32 32, %v2025_v32  ;;  %v627_v63 = vshrl.u32 %v626_v37, 5  ;;  %v2055_v9 = vand.u32 8388607, %v718_v45 }
 0x106   : > { %v467_v39 = vadd.s32 536870912, %v466_v33  ;;  %v2038_v46 = vsub.s32 %v570_v2, %v573_v26  ;;  %v622_v47 = vor.u32 8388608, %v621_v40  ;;  %v744_v11 = vshll.u32 %v1798_v59, %v2025_v32 }
 0x107   : > { %v629_v41 = vsub.s32 32, %v628_v38  ;;  %v745_v53 = vshrl.u32 %v1799_v61, %v2031_v49  ;;  %v631_v56 = vshll.u32 %v1795_v52, %v628_v38  ;;  %v634_v58 = vshll.u32 %v1796_v55, %v628_v38 }
 0x108   : > { %v2033_v42 = vshrl.u32 %v467_v39, 30  ;;  %v640_v60 = vshll.u32 %v1798_v59, %v628_v38  ;;  %v637_v0 = vshll.u32 %v1797_v57, %v628_v38  ;;  %v643_v48 = vshll.u32 %v1799_v61, %v628_v38 }
 0x109   : > { %v632_v43 = vshrl.u32 %v1796_v55, %v629_v41  ;;  %v635_v44 = vshrl.u32 %v1797_v57, %v629_v41  ;;  %v638_v50 = vshrl.u32 %v1798_v59, %v629_v41  ;;  %v641_v51 = vshrl.u32 %v1799_v61, %v629_v41 }
 0x10a   : > { %v469_v62 = vshll.u32 %v2033_v42, 30  ;;  %v644_v1 = vshrl.u32 %v1800_v4, %v629_v41  ;;  %v662_v8 = vshll.u32 %v622_v47, 8  ;;  %v576_v10 = vsub.s32 0, %v2038_v46 }
 0x10b   : > { %v633_v2 = vor.u32 %v632_v43, %v631_v56  ;;  %v636_v3 = vor.u32 %v635_v44, %v634_v58  ;;  %v642_v5 = vor.u32 %v641_v51, %v640_v60  ;;  %v639_v7 = vor.u32 %v638_v50, %v637_v0 }
 0x10c   : > { %v747_v12 = vshll.u32 %v1799_v61, %v2025_v32  ;;  %v645_v13 = vor.u32 %v644_v1, %v643_v48  ;;  %v2062_v15 = vsub.s32 %v466_v33, %v469_v62  ;;  %v748_v16 = vshrl.u32 %v1800_v4, %v2031_v49 }
 0x10d   : > { %vm646_vm0 = vcmp.lt.s32.totalorder %v627_v63, 1  ;;  %vm649_vm1 = vcmp.lt.s32.totalorder %v627_v63, 4  ;;  %v746_v17 = vor.u32 %v745_v53, %v744_v11  ;;  %v630_v54 = vshrl.u32 %v1795_v52, %v629_v41 }
 0x10e   : > { %v654_v20 = vsel %vm646_vm0, %v633_v2, %v636_v3  ;;  %v655_v21 = vsel %vm649_vm1, %v642_v5, 920167782  ;;  %v659_v23 = vsel %vm649_vm1, %v645_v13, 1326507024  ;;  %vm648_vm2 = vcmp.lt.s32.totalorder %v627_v63, 3 }
 0x10f   : > { %v651_v28 = vsel %vm649_vm1, %v639_v7, 2102212464  ;;  %v658_v30 = vsel %vm646_vm0, %v636_v3, %v639_v7  ;;  %v1532_v37 = vmin.u32 %v576_v10, %v2038_v46  ;;  %vm647_vm3 = vcmp.lt.s32.totalorder %v627_v63, 2 }
 0x110   : > { %v656_v38 = vsel %vm648_vm2, %v639_v7, %v655_v21  ;;  %v660_v33 = vsel %vm648_vm2, %v642_v5, %v659_v23  ;;  %v472_v26 = vsub.s32 0, %v2062_v15  ;;  %v650_v39 = vsel %vm646_vm0, %v630_v54, %v633_v2 }
 0x111   : > { %v657_v40 = vsel %vm647_vm3, %v654_v20, %v656_v38  ;;  %v736_v43 = vshrl.u32 %v1796_v55, %v2031_v49  ;;  %v652_v44 = vsel %vm648_vm2, %v636_v3, %v651_v28  ;;  %v661_v47 = vsel %vm647_vm3, %v658_v30, %v660_v33 }
 0x112   : > { %v2073_v41 = vmul.u32.u64.low %v662_v8, %v657_v40  ;;  %v2074_v50 = vmul.u32.u64.high %v662_v8, %v657_v40, %v2073_v41  ;;  %v749_v51 = vor.u32 %v748_v16, %v747_v12  ;;  %v735_v58 = vshll.u32 %v1795_v52, %v2025_v32 }
 0x113   : > { %v2077_v53 = vmul.u32.u64.low %v662_v8, %v661_v47  ;;  %v2078_v56 = vmul.u32.u64.high %v662_v8, %v661_v47, %v2077_v53  ;;  %v738_v60 = vshll.u32 %v1796_v55, %v2025_v32  ;;  %v739_v62 = vshrl.u32 %v1797_v57, %v2031_v49 }
 0x114   : > { %v741_v0 = vshll.u32 %v1797_v57, %v2025_v32  ;;  %v742_v1 = vshrl.u32 %v1798_v59, %v2031_v49  ;;  %v578_v2 = vclz %v1532_v37  ;;  %v1528_v3 = vmin.u32 %v472_v26, %v2062_v15 }
 0x115   : > { %vm753_vm4 = vcmp.lt.s32.totalorder %v2051_v6, 4  ;;  %v653_v5 = vsel %vm647_vm3, %v650_v39, %v652_v44  ;;  %v672_v48 = vadd.s32 1, %v2074_v50  ;;  %v737_v7 = vor.u32 %v736_v43, %v735_v58 }
 0x116   : > { %v740_v10 = vor.u32 %v739_v62, %v738_v60  ;;  %v743_v11 = vor.u32 %v742_v1, %v741_v0  ;;  %v759_v12 = vsel %vm753_vm4, %v746_v17, 920167782  ;;  %v763_v32 = vsel %vm753_vm4, %v749_v51, 1326507024  ;;  %v822_v0 = vld [vmem:[%s2548_s3] sm:$0xff] }
 0x117   : > { %v669_v13 = vmul.u32 %v662_v8, %v653_v5  ;;  %vm671_vm5 = vc.u32 %v2078_v56, %v2073_v41  ;;  %v726_v16 = vor.u32 8388608, %v2055_v9  ;;  %v474_v20 = vclz %v1528_v3 }
 0x118   : > { %v673_v63 = vsel %vm671_vm5, %v672_v48, %v2074_v50  ;;  %vm750_vm6 = vcmp.lt.s32.totalorder %v2051_v6, 1  ;;  %vm752_vm7 = vcmp.lt.s32.totalorder %v2051_v6, 3  ;;  %v1533_v21 = vadd.s32 4294967294, %v578_v2 }
 0x119   : > { %v674_v23 = vadd.s32 %v673_v63, %v669_v13  ;;  %v758_v54 = vsel %vm750_vm6, %v737_v7, %v740_v10  ;;  %v760_v8 = vsel %vm752_vm7, %v743_v11, %v759_v12  ;;  %v734_v28 = vshrl.u32 %v1795_v52, %v2031_v49 }
 0x11a   : > { %vm751_vm8 = vcmp.lt.s32.totalorder %v2051_v6, 2  ;;  %v755_v30 = vsel %vm753_vm4, %v743_v11, 2102212464  ;;  %v762_v37 = vsel %vm750_vm6, %v740_v10, %v743_v11  ;;  %v764_v38 = vsel %vm752_vm7, %v746_v17, %v763_v32 }
 0x11b   : > { %v675_v9 = vadd.s32 536870912, %v674_v23  ;;  %v1529_v33 = vadd.s32 4294967294, %v474_v20  ;;  %v761_v26 = vsel %vm751_vm8, %v758_v54, %v760_v8  ;;  %v765_v39 = vsel %vm751_vm8, %v762_v37, %v764_v38 }
 0x11c   : > { %v766_v49 = vshll.u32 %v726_v16, 8  ;;  %vm1534_vm9 = vcmp.lt.s32.totalorder %v1533_v21, 0  ;;  %v754_v43 = vsel %vm750_vm6, %v734_v28, %v737_v7  ;;  %v756_v44 = vsel %vm752_vm7, %v740_v10, %v755_v30 }
 0x11d   : > { %v2121_v40 = vshrl.u32 %v675_v9, 30  ;;  %v581_v58 = vsel %vm1534_vm9, 0, %v1533_v21  ;;  %vm1530_vm10 = vcmp.lt.s32.totalorder %v1529_v33, 0  ;;  %v757_v62 = vsel %vm751_vm8, %v754_v43, %v756_v44 }
 0x11e   : > { %v2127_v47 = vmul.u32.u64.low %v766_v49, %v765_v39  ;;  %v2128_v50 = vmul.u32.u64.high %v766_v49, %v765_v39, %v2127_v47  ;;  %v2131_v51 = vmul.u32.u64.low %v766_v49, %v761_v26  ;;  %v2132_v53 = vmul.u32.u64.high %v766_v49, %v761_v26, %v2131_v51 }
 0x11f   : > { %v677_v17 = vshll.u32 %v2121_v40, 30  ;;  %v586_v1 = vsub.s32 4294967266, %v581_v58  ;;  %v477_v2 = vsel %vm1530_vm10, 0, %v1529_v33  ;;  %v773_v48 = vmul.u32 %v766_v49, %v757_v62 }
 0x120   : > { %vm775_vm11 = vc.u32 %v2128_v50, %v2131_v51  ;;  %v776_v5 = vadd.s32 1, %v2132_v53  ;;  %vm850_vm12 = vcmask 261120   ;;  %v482_v6 = vsub.s32 4294967266, %v477_v2 }
 0x121   : > { %v678_v60 = vsub.s32 %v674_v23, %v677_v17  ;;  %1601 = vmatprep.mubr.msk.f32.mxu1 %vm850_vm12, %v822_v0  ;;  %v587_v12 = vadd.s32 127, %v586_v1  ;;  %v582_v16 = vsub.s32 32, %v581_v58  ;;  %v566_v23 = vadd.s32 %v1987_v36, %v1984_v34 }
 0x122   : > { %v777_v10 = vsel %vm775_vm11, %v776_v5, %v2132_v53  ;;  %v483_v63 = vadd.s32 127, %v482_v6  ;;  %v478_v8 = vsub.s32 32, %v477_v2  ;;  %v670_v37 = vadd.s32 %v2073_v41, %v2078_v56 }
 0x123   : > { %v680_v3 = vsub.s32 0, %v678_v60  ;;  %v778_v11 = vadd.s32 %v777_v10, %v773_v48  ;;  %v588_v54 = vshll.u32 %v587_v12, 23  ;;  %v584_v30 = vshrl.u32 %v566_v23, %v582_v16 }
 0x124   : > { %v583_v26 = vshll.u32 %v2038_v46, %v581_v58  ;;  %v462_v39 = vadd.s32 %v2009_v14, %v2015_v18  ;;  %v484_v49 = vshll.u32 %v483_v63, 23  ;;  %v479_v41 = vshll.u32 %v2062_v15, %v477_v2 }
 0x125   : > { %v1536_v7 = vmin.u32 %v680_v3, %v678_v60  ;;  %v779_v13 = vadd.s32 536870912, %v778_v11  ;;  %v589_v34 = vor.u32 4788187, %v588_v54  ;;  %v774_v15 = vadd.s32 %v2131_v51, %v2128_v50 }
 0x126   : > { %v480_v17 = vshrl.u32 %v462_v39, %v478_v8  ;;  %v585_v62 = vor.u32 %v584_v30, %v583_v26  ;;  %v485_v56 = vor.u32 4788187, %v484_v49  ;;  %vm616_vm15 = vcmp.lt.s32.totalorder %v1954_v35, 0 }
 0x127   : > { %v682_v32 = vclz %v1536_v7  ;;  %v2145_v21 = vshrl.u32 %v779_v13, 30  ;;  %v590_v5 = vand.u32 2147483647, %v589_v34  ;;  %vm2163_vm0 = vcmp.le.f32.partialorder %v614_v29, 0.7853982 }
 0x128   : > { %v481_v58 = vor.u32 %v480_v17, %v479_v41  ;;  %v592_v14 = vcvt.s32.f32 %v585_v62  ;;  %v486_v10 = vand.u32 2147483647, %v485_v56  ;;  %vm512_vm1 = vcmp.lt.s32.totalorder %v1940_v19, 0 }
 0x129   : > { %v1537_v20 = vadd.s32 4294967294, %v682_v32  ;;  %v781_v9 = vshll.u32 %v2145_v21, 30  ;;  %vm408_vm2 = vcmp.lt.s32.totalorder %v1944_v24, 0  ;;  %vm2176_vm3 = vcmp.le.f32.partialorder %v510_v22, 0.7853982 }
 0x12a   : > { %v593_v6 = vmul.f32 %v592_v14, %v590_v5  ;;  %v488_v12 = vcvt.s32.f32 %v481_v58  ;;  %vm2188_vm4 = vcmp.le.f32.partialorder %v406_v27, 0.7853982  ;;  %v596_v17 = vsub.s32 4, %v2018_v25 }
 0x12b   : > { %vm1538_vm13 = vcmp.lt.s32.totalorder %v1537_v20, 0  ;;  %v782_v43 = vsub.s32 %v778_v11, %v781_v9  ;;  %vm720_vm5 = vcmp.lt.s32.totalorder %v1950_v31, 0  ;;  %vm2200_vm6 = vcmp.le.f32.partialorder %v718_v45, 0.7853982 }
 0x12c   : > { %v685_v28 = vsel %vm1538_vm13, 0, %v1537_v20  ;;  %v489_v16 = vmul.f32 %v488_v12, %v486_v10  ;;  %v594_v63 = vxor.u32 2147483648, %v593_v6  ;;  %v597_v41 = vsel %vm512_vm1, %v596_v17, %v2018_v25  ;;  %v848_v17 = vpop.permute.xlu0 %847 }
 0x12d   : > { %v686_v38 = vsub.s32 32, %v685_v28  ;;  %v690_v33 = vsub.s32 4294967266, %v685_v28  ;;  %v687_v36 = vshll.u32 %v678_v60, %v685_v28  ;;  %v784_v53 = vsub.s32 0, %v782_v43 }
 0x12e   : > { %v490_v9 = vxor.u32 2147483648, %v489_v16  ;;  %v595_v51 = vsel %vm512_vm1, %v594_v63, %v593_v6  ;;  %v492_v45 = vsub.s32 4, %v2033_v42  ;;  %vm810_vm7 = vweird.f32 %v1950_v31 }
 0x12f   : > { %v688_v44 = vshrl.u32 %v670_v37, %v686_v38  ;;  %v691_v47 = vadd.s32 127, %v690_v33  ;;  %v1540_v3 = vmin.u32 %v784_v53, %v782_v43  ;;  %v804_v53 = vsub.s32 4, %v2145_v21 }
 0x130   : > { %v491_v29 = vsel %vm408_vm2, %v490_v9, %v489_v16  ;;  %v493_v58 = vsel %vm408_vm2, %v492_v45, %v2033_v42  ;;  %vm706_vm8 = vweird.f32 %v1954_v35  ;;  %v838_v27 = vpop.permute.xlu0 %837 }
 0x131   : > { %v689_v0 = vor.u32 %v688_v44, %v687_v36  ;;  %v692_v1 = vshll.u32 %v691_v47, 23  ;;  %v786_v48 = vclz %v1540_v3  ;;  %v700_v36 = vsub.s32 4, %v2121_v40 }
 0x132   : > { %v494_v44 = vsel %vm2188_vm4, %v1944_v24, %v491_v29  ;;  %v805_v56 = vsel %vm720_vm5, %v804_v53, %v2145_v21  ;;  %v495_v21 = vsel %vm2188_vm4, 0, %v493_v58  ;;  %v843_v53 = vpop.permute.xlu1 %842 }
 0x133   : > { %v693_v46 = vor.u32 4788187, %v692_v1  ;;  %v696_v7 = vcvt.s32.f32 %v689_v0  ;;  %v1541_v60 = vadd.s32 4294967294, %v786_v48  ;;  %v701_v0 = vsel %vm616_vm15, %v700_v36, %v2121_v40 }
 0x134   : > { %v703_v3 = vsel %vm2163_vm0, 0, %v701_v0  ;;  %v599_v40 = vsel %vm2176_vm3, 0, %v597_v41  ;;  %v807_v5 = vsel %vm2200_vm6, 0, %v805_v56 }
 0x135   : > { %v694_v18 = vand.u32 2147483647, %v693_v46  ;;  %vm1542_vm14 = vcmp.lt.s32.totalorder %v1541_v60, 0  ;;  %v707_v46 = vadd.s32 3, %v703_v3  ;;  %v603_v14 = vadd.s32 3, %v599_v40 }
 0x136   : > { %v789_v13 = vsel %vm1542_vm14, 0, %v1541_v60 }
 0x137   : > { %v697_v11 = vmul.f32 %v696_v7, %v694_v18  ;;  %v790_v2 = vsub.s32 32, %v789_v13  ;;  %v794_v20 = vsub.s32 4294967266, %v789_v13  ;;  %v791_v54 = vshll.u32 %v782_v43, %v789_v13 }
 0x138   : > { %v598_v43 = vsel %vm2176_vm3, %v1940_v19, %v595_v51  ;;  %v811_v18 = vadd.s32 3, %v807_v5  ;;  %v708_v7 = vand.u32 3, %v707_v46  ;;  %v604_v12 = vand.u32 3, %v603_v14 }
 0x139   : > { %v698_v32 = vxor.u32 2147483648, %v697_v11  ;;  %v792_v8 = vshrl.u32 %v774_v15, %v790_v2  ;;  %v795_v28 = vadd.s32 127, %v794_v20 }
 0x13a   : > { %v812_v16 = vand.u32 3, %v811_v18  ;;  %vm710_vm9 = vcmp.eq.s32.totalorder %v708_v7, 0  ;;  %vm713_vm10 = vcmp.eq.s32.totalorder %v708_v7, 2  ;;  %vm709_vm11 = vcmp.lt.s32.totalorder %v708_v7, 2 }
 0x13b   : > { %v699_v23 = vsel %vm616_vm15, %v698_v32, %v697_v11  ;;  %v793_v30 = vor.u32 %v792_v8, %v791_v54  ;;  %v796_v37 = vshll.u32 %v795_v28, 23  ;;  %v499_v32 = vadd.s32 3, %v495_v21 }
 0x13c   : > { %v702_v50 = vsel %vm2163_vm0, %v1954_v35, %v699_v23  ;;  %vm606_vm13 = vcmp.eq.s32.totalorder %v604_v12, 0  ;;  %vm817_vm14 = vcmp.eq.s32.totalorder %v812_v16, 2  ;;  %vm814_vm15 = vcmp.eq.s32.totalorder %v812_v16, 0  ;;  %v823_v35 = vld [vmem:[%s2548_s3 + $0x8] sm:$0xff] }
 0x13d   : > { %v797_v33 = vor.u32 4788187, %v796_v37  ;;  %v800_v49 = vcvt.s32.f32 %v793_v30  ;;  %1700 = vcosq.f32 %v702_v50  ;;  %v500_v28 = vand.u32 3, %v499_v32 }
 0x13e   : > { %1702 = vsinq.f32 %v702_v50  ;;  %vm609_vm0 = vcmp.eq.s32.totalorder %v604_v12, 2  ;;  %vm813_vm1 = vcmp.lt.s32.totalorder %v812_v16, 2  ;;  %vm605_vm2 = vcmp.lt.s32.totalorder %v604_v12, 2 }
 0x13f   : > { %v798_v39 = vand.u32 2147483647, %v797_v33  ;;  %1704 = vcosq.f32 %v598_v43  ;;  %vm502_vm3 = vcmp.eq.s32.totalorder %v500_v28, 0  ;;  %vm505_vm4 = vcmp.eq.s32.totalorder %v500_v28, 2 }
 0x140   : > { %1706 = vsinq.f32 %v598_v43 }
 0x141   : > { %v801_v34 = vmul.f32 %v800_v49, %v798_v39  ;;  %1708 = vcosq.f32 %v494_v44 }
 0x142   : > { %1710 = vsinq.f32 %v494_v44 }
 0x143   : > { %v802_v47 = vxor.u32 2147483648, %v801_v34 }
 0x145   : > { %v803_v62 = vsel %vm720_vm5, %v802_v47, %v801_v34  ;;  %vm501_vm5 = vcmp.lt.s32.totalorder %v500_v28, 2  ;;  %v824_v47 = vld [vmem:[%s2548_s3 + $0x10] sm:$0xff] }
 0x146   : > { %v806_v1 = vsel %vm2200_vm6, %v1950_v31, %v803_v62  ;;  %vm602_vm6 = vweird.f32 %v1940_v19  ;;  %v825_v19 = vld [vmem:[%s2548_s3 + $0x18] sm:$0xff] }
 0x147   : > { %1712 = vcosq.f32 %v806_v1 }
 0x148   : > { %1714 = vsinq.f32 %v806_v1  ;;  %v833_v1 = vpop.permute.xlu1 %832 }
 0x14a   : > { %v1701_v25 = vpop.eup %1700 }
 0x14b   : > { %v1703_v48 = vpop.eup %1702  ;;  %v714_v6 = vxor.u32 2147483648, %v1701_v25 }
 0x14c   : > { %v1705_v10 = vpop.eup %1704  ;;  %v711_v60 = vxor.u32 2147483648, %v1703_v48 }
 0x14d   : > { %v1707_v11 = vpop.eup %1706  ;;  %v715_v20 = vsel %vm713_vm10, %v714_v6, %v1703_v48  ;;  %v610_v23 = vxor.u32 2147483648, %v1705_v10 }
 0x14e   : > { %v1709_v13 = vpop.eup %1708  ;;  %v712_v2 = vsel %vm710_vm9, %v1701_v25, %v711_v60  ;;  %v607_v63 = vxor.u32 2147483648, %v1707_v11  ;;  %vm498_vm9 = vweird.f32 %v1944_v24  ;;  %v1801_v24 = vmov 0.0  }
 0x14f   : > { %v1711_v15 = vpop.eup %1710  ;;  %v506_v37 = vxor.u32 2147483648, %v1709_v13  ;;  %v716_v50 = vsel %vm709_vm11, %v712_v2, %v715_v20  ;;  %v611_v26 = vsel %vm609_vm0, %v610_v23, %v1707_v11  ;;  %1607 = vmatprep.subr.mxu0 %v1801_v24 }
 0x150   : > { %v503_v30 = vxor.u32 2147483648, %v1711_v15  ;;  %v608_v33 = vsel %vm606_vm13, %v1705_v10, %v607_v63  ;;  %v717_v49 = vsel %vm706_vm8, nan, %v716_v50 }
 0x151   : > { %v507_v34 = vsel %vm505_vm4, %v506_v37, %v1711_v15  ;;  %v612_v36 = vsel %vm605_vm2, %v608_v33, %v611_v26 }
 0x152   : > { %v504_v43 = vsel %vm502_vm3, %v1709_v13, %v503_v30  ;;  %v613_v44 = vsel %vm602_vm6, nan, %v612_v36 }
 0x153   : > { %v508_v22 = vsel %vm501_vm5, %v504_v43, %v507_v34 }
 0x154   : > { %v1713_v42 = vpop.eup %1712  ;;  %v509_v31 = vsel %vm498_vm9, nan, %v508_v22 }
 0x155   : > { %v1715_v54 = vpop.eup %1714  ;;  %v818_v8 = vxor.u32 2147483648, %v1713_v42 }
 0x156   : > { %v815_v9 = vxor.u32 2147483648, %v1715_v54 }
 0x157   : > { %v819_v38 = vsel %vm817_vm14, %v818_v8, %v1715_v54 }
 0x158   : > { %v816_v51 = vsel %vm814_vm15, %v1713_v42, %v815_v9 }
 0x159   : > { %v820_v29 = vsel %vm813_vm1, %v816_v51, %v819_v38 }
 0x15a   : > { %v821_v39 = vsel %vm810_vm7, nan, %v820_v29 }
 0x15b   : > { %1593 = vmatprep.subr.mxu1 %v821_v39 }
 0x15c   : > { %1594 = vmatpush3.msra.mxu1 %v821_v39 }
 0x15d   : > { %1595 = vmatprep.subr.mxu1 %v717_v49 }
 0x15e   : > { %1596 = vmatpush3.msra.mxu1 %v717_v49 }
 0x15f   : > { %1597 = vmatprep.subr.mxu1 %v613_v44 }
 0x160   : > { %1598 = vmatpush3.msra.mxu1 %v613_v44 }
 0x161   : > { %1599 = vmatprep.subr.mxu1 %v509_v31 }
 0x162   : > { %1600 = vmatpush3.msra.mxu1 %v509_v31 }
 0x163   : > { %1602 = vmatmul.mubr.msk.f32.vlgmr.msra.gmra.mxu1 %vm850_vm12, %v823_v35 }
 0x164   : > { %1604 = vmatprep.mubr.msk.f32.mxu1 %vm850_vm12, %v824_v47 }
 0x167   : > { %1605 = vmatmul.mubr.msk.f32.gmra.mxu1 %vm850_vm12, %v825_v19 }
 0x223   : > { %v1603_v62 = vpop.f32.mrf.mxu1 }
 0x224   : > { %v2247_v0 = vadd.f32 %v1603_v62, %v838_v27 }
 0x225   : > { %v929_v41 = vpop.f32.mrf.mxu1 }
 0x226   : > { %v1052_v45 = vand.u32 2147483647, %v2247_v0  ;;  %v1055_v56 = vand.u32 2139095040, %v2247_v0  ;;  %v2251_v3 = vadd.f32 %v929_v41, %v833_v1 }
 0x227   : > { %v1606_v40 = vpop.f32.mrf.mxu1 }
 0x228   : > { %v1056_v5 = vshrl.u32 %v1055_v56, 23  ;;  %v1059_v46 = vand.u32 8388607, %v1052_v45  ;;  %v948_v58 = vand.u32 2147483647, %v2251_v3  ;;  %v951_v25 = vand.u32 2139095040, %v2251_v3 }
 0x229   : > { %v2257_v48 = vadd.f32 %v1606_v40, %v848_v17  ;;  %v939_v12 = vpop.f32.mrf.mxu1 }
 0x22a   : > { %v1551_v14 = vadd.s32 4294967169, %v1056_v5  ;;  %v952_v18 = vshrl.u32 %v951_v25, 23  ;;  %v955_v21 = vand.u32 8388607, %v948_v58  ;;  %v1060_v10 = vor.u32 8388608, %v1059_v46 }
 0x22b   : > { %v1263_v11 = vand.u32 2139095040, %v2257_v48  ;;  %v2262_v42 = vadd.f32 %v939_v12, %v843_v53  ;;  %v1260_v63 = vand.u32 2147483647, %v2257_v48 }
 0x22c   : > { %v1062_v7 = vadd.s32 1, %v1551_v14  ;;  %v1547_v60 = vadd.s32 4294967169, %v952_v18  ;;  %v956_v6 = vor.u32 8388608, %v955_v21  ;;  %v2264_v2 = vshll.u32 %v1060_v10, 8 }
 0x22d   : > { %v1264_v23 = vshrl.u32 %v1263_v11, 23 }
 0x22e   : > { %vm1063_vm7 = vcmp.gt.s32.totalorder %v1062_v7, 0  ;;  %v958_v13 = vadd.s32 1, %v1547_v60  ;;  %v2266_v20 = vshll.u32 %v956_v6, 8 }
 0x22f   : > { %v1064_v32 = vsel %vm1063_vm7, %v1062_v7, 0  ;;  %v1559_v40 = vadd.s32 4294967169, %v1264_v23 }
 0x230   : > { %v1065_v16 = vshrl.u32 %v1064_v32, 5  ;;  %v1066_v15 = vand.u32 31, %v1064_v32  ;;  %vm959_vm8 = vcmp.gt.s32.totalorder %v958_v13, 0 }
 0x231   : > { %v960_v34 = vsel %vm959_vm8, %v958_v13, 0 }
 0x232   : > { %v1067_v54 = vsub.s32 32, %v1066_v15  ;;  %v1069_v8 = vshll.u32 %v1795_v52, %v1066_v15  ;;  %v1072_v28 = vshll.u32 %v1796_v55, %v1066_v15  ;;  %v1075_v9 = vshll.u32 %v1797_v57, %v1066_v15 }
 0x233   : > { %v1078_v30 = vshll.u32 %v1798_v59, %v1066_v15  ;;  %v1081_v37 = vshll.u32 %v1799_v61, %v1066_v15  ;;  %vm1084_vm10 = vcmp.lt.s32.totalorder %v1065_v16, 1  ;;  %vm1085_vm11 = vcmp.lt.s32.totalorder %v1065_v16, 2 }
 0x234   : > { %v1070_v38 = vshrl.u32 %v1796_v55, %v1067_v54  ;;  %v1073_v50 = vshrl.u32 %v1797_v57, %v1067_v54  ;;  %v1076_v51 = vshrl.u32 %v1798_v59, %v1067_v54  ;;  %v1068_v33 = vshrl.u32 %v1795_v52, %v1067_v54 }
 0x235   : > { %v1079_v26 = vshrl.u32 %v1799_v61, %v1067_v54  ;;  %v1082_v29 = vshrl.u32 %v1800_v4, %v1067_v54  ;;  %vm1086_vm13 = vcmp.lt.s32.totalorder %v1065_v16, 3  ;;  %vm1087_vm14 = vcmp.lt.s32.totalorder %v1065_v16, 4 }
 0x236   : > { %v1071_v39 = vor.u32 %v1070_v38, %v1069_v8  ;;  %v1074_v49 = vor.u32 %v1073_v50, %v1072_v28  ;;  %v1077_v43 = vor.u32 %v1076_v51, %v1075_v9  ;;  %v962_v44 = vand.u32 31, %v960_v34 }
 0x237   : > { %v1080_v36 = vor.u32 %v1079_v26, %v1078_v30  ;;  %v1083_v22 = vor.u32 %v1082_v29, %v1081_v37  ;;  %v961_v25 = vshrl.u32 %v960_v34, 5 }
 0x238   : > { %v1088_v31 = vsel %vm1084_vm10, %v1068_v33, %v1071_v39  ;;  %v1089_v35 = vsel %vm1087_vm14, %v1077_v43, 2102212464  ;;  %v1092_v47 = vsel %vm1084_vm10, %v1071_v39, %v1074_v49  ;;  %v1096_v19 = vsel %vm1084_vm10, %v1074_v49, %v1077_v43 }
 0x239   : > { %v1090_v17 = vsel %vm1086_vm13, %v1074_v49, %v1089_v35  ;;  %v1093_v53 = vsel %vm1087_vm14, %v1080_v36, 920167782  ;;  %v1097_v27 = vsel %vm1087_vm14, %v1083_v22, 1326507024  ;;  %v963_v62 = vsub.s32 32, %v962_v44 }
 0x23a   : > { %v1091_v1 = vsel %vm1085_vm11, %v1088_v31, %v1090_v17  ;;  %v1094_v41 = vsel %vm1086_vm13, %v1077_v43, %v1093_v53  ;;  %v1098_v56 = vsel %vm1086_vm13, %v1080_v36, %v1097_v27  ;;  %v965_v14 = vshll.u32 %v1795_v52, %v962_v44 }
 0x23b   : > { %v1095_v5 = vsel %vm1085_vm11, %v1092_v47, %v1094_v41  ;;  %v1099_v46 = vsel %vm1085_vm11, %v1096_v19, %v1098_v56  ;;  %v1107_v60 = vmul.u32 %v2264_v2, %v1091_v1  ;;  %v966_v6 = vshrl.u32 %v1796_v55, %v963_v62 }
 0x23c   : > { %v2292_v18 = vmul.u32.u64.low %v2264_v2, %v1099_v46  ;;  %v2293_v21 = vmul.u32.u64.high %v2264_v2, %v1099_v46, %v2292_v18  ;;  %v2296_v7 = vmul.u32.u64.low %v2264_v2, %v1095_v5  ;;  %v2297_v10 = vmul.u32.u64.high %v2264_v2, %v1095_v5, %v2296_v7 }
 0x23d   : > { %v968_v11 = vshll.u32 %v1796_v55, %v962_v44  ;;  %v969_v12 = vshrl.u32 %v1797_v57, %v963_v62  ;;  %v971_v32 = vshll.u32 %v1797_v57, %v962_v44  ;;  %v972_v13 = vshrl.u32 %v1798_v59, %v963_v62 }
 0x23e   : > { %v974_v16 = vshll.u32 %v1798_v59, %v962_v44  ;;  %v975_v15 = vshrl.u32 %v1799_v61, %v963_v62  ;;  %v967_v23 = vor.u32 %v966_v6, %v965_v14  ;;  %v977_v8 = vshll.u32 %v1799_v61, %v962_v44 }
 0x23f   : > { %v970_v54 = vor.u32 %v969_v12, %v968_v11  ;;  %v978_v2 = vshrl.u32 %v1800_v4, %v963_v62  ;;  %vm1109_vm15 = vc.u32 %v2293_v21, %v2296_v7  ;;  %v1110_v28 = vadd.s32 1, %v2297_v10 }
 0x240   : > { %v964_v9 = vshrl.u32 %v1795_v52, %v963_v62  ;;  %v973_v30 = vor.u32 %v972_v13, %v971_v32  ;;  %v976_v37 = vor.u32 %v975_v15, %v974_v16  ;;  %vm980_vm0 = vcmp.lt.s32.totalorder %v961_v25, 1 }
 0x241   : > { %v979_v38 = vor.u32 %v978_v2, %v977_v8  ;;  %vm981_vm1 = vcmp.lt.s32.totalorder %v961_v25, 2  ;;  %v1111_v50 = vsel %vm1109_vm15, %v1110_v28, %v2297_v10  ;;  %vm982_vm2 = vcmp.lt.s32.totalorder %v961_v25, 3 }
 0x242   : > { %vm983_vm3 = vcmp.lt.s32.totalorder %v961_v25, 4  ;;  %v988_v51 = vsel %vm980_vm0, %v967_v23, %v970_v54  ;;  %v1112_v33 = vadd.s32 %v1111_v50, %v1107_v60  ;;  %v992_v39 = vsel %vm980_vm0, %v970_v54, %v973_v30 }
 0x243   : > { %v985_v26 = vsel %vm983_vm3, %v973_v30, 2102212464  ;;  %v989_v29 = vsel %vm983_vm3, %v976_v37, 920167782  ;;  %v984_v49 = vsel %vm980_vm0, %v964_v9, %v967_v23  ;;  %v993_v34 = vsel %vm983_vm3, %v979_v38, 1326507024 }
 0x244   : > { %v990_v43 = vsel %vm982_vm2, %v973_v30, %v989_v29  ;;  %v1270_v36 = vadd.s32 1, %v1559_v40  ;;  %v1113_v22 = vadd.s32 536870912, %v1112_v33  ;;  %v986_v44 = vsel %vm982_vm2, %v970_v54, %v985_v26 }
 0x245   : > { %v991_v31 = vsel %vm981_vm1, %v988_v51, %v990_v43  ;;  %v994_v35 = vsel %vm982_vm2, %v976_v37, %v993_v34  ;;  %v1159_v53 = vand.u32 2139095040, %v2262_v42  ;;  %v987_v41 = vsel %vm981_vm1, %v984_v49, %v986_v44 }
 0x246   : > { %v995_v47 = vsel %vm981_vm1, %v992_v39, %v994_v35  ;;  %v2318_v19 = vmul.u32.u64.low %v2266_v20, %v991_v31  ;;  %v2319_v17 = vmul.u32.u64.high %v2266_v20, %v991_v31, %v2318_v19  ;;  %v2323_v27 = vshrl.u32 %v1113_v22, 30 }
 0x247   : > { %v2326_v62 = vmul.u32.u64.low %v2266_v20, %v995_v47  ;;  %v2327_v1 = vmul.u32.u64.high %v2266_v20, %v995_v47, %v2326_v62  ;;  %vm1271_vm4 = vcmp.gt.s32.totalorder %v1270_v36, 0  ;;  %v1267_v14 = vand.u32 8388607, %v1260_v63 }
 0x248   : > { %v1272_v56 = vsel %vm1271_vm4, %v1270_v36, 0  ;;  %v1115_v40 = vshll.u32 %v2323_v27, 30  ;;  %v1006_v46 = vadd.s32 1, %v2319_v17  ;;  %v1003_v18 = vmul.u32 %v2266_v20, %v987_v41 }
 0x249   : > { %v1274_v5 = vand.u32 31, %v1272_v56  ;;  %vm1005_vm5 = vc.u32 %v2327_v1, %v2318_v19  ;;  %v1160_v60 = vshrl.u32 %v1159_v53, 23  ;;  %v1273_v11 = vshrl.u32 %v1272_v56, 5 }
 0x24a   : > { %v2337_v6 = vsub.s32 %v1112_v33, %v1115_v40  ;;  %v1007_v25 = vsel %vm1005_vm5, %v1006_v46, %v2319_v17  ;;  %v1268_v33 = vor.u32 8388608, %v1267_v14  ;;  %vm1802_vm4 = vmmov 0  }
 0x24b   : > { %v1275_v10 = vsub.s32 32, %v1274_v5  ;;  %v1277_v12 = vshll.u32 %v1795_v52, %v1274_v5  ;;  %v1008_v32 = vadd.s32 %v1007_v25, %v1003_v18  ;;  %v1280_v16 = vshll.u32 %v1796_v55, %v1274_v5  ;;  %1615 = vmatprep.mubr.msk.f32.mxu0 %vm1802_vm4, %v1801_v24 }
 0x24c   : > { %v1283_v15 = vshll.u32 %v1797_v57, %v1274_v5  ;;  %v1286_v54 = vshll.u32 %v1798_v59, %v1274_v5  ;;  %v1289_v9 = vshll.u32 %v1799_v61, %v1274_v5  ;;  %v1118_v26 = vsub.s32 0, %v2337_v6 }
 0x24d   : > { %v1278_v13 = vshrl.u32 %v1796_v55, %v1275_v10  ;;  %v1281_v20 = vshrl.u32 %v1797_v57, %v1275_v10  ;;  %v1284_v23 = vshrl.u32 %v1798_v59, %v1275_v10  ;;  %v1287_v8 = vshrl.u32 %v1799_v61, %v1275_v10 }
 0x24e   : > { %v1009_v2 = vadd.s32 536870912, %v1008_v32  ;;  %v1290_v50 = vshrl.u32 %v1800_v4, %v1275_v10  ;;  %vm1292_vm6 = vcmp.lt.s32.totalorder %v1273_v11, 1  ;;  %v1555_v39 = vadd.s32 4294967169, %v1160_v60 }
 0x24f   : > { %v1279_v28 = vor.u32 %v1278_v13, %v1277_v12  ;;  %v1282_v30 = vor.u32 %v1281_v20, %v1280_v16  ;;  %v1285_v37 = vor.u32 %v1284_v23, %v1283_v15  ;;  %v1288_v38 = vor.u32 %v1287_v8, %v1286_v54 }
 0x250   : > { %v2350_v51 = vshrl.u32 %v1009_v2, 30  ;;  %v1291_v29 = vor.u32 %v1290_v50, %v1289_v9  ;;  %vm1294_vm9 = vcmp.lt.s32.totalorder %v1273_v11, 3  ;;  %vm1295_vm7 = vcmp.lt.s32.totalorder %v1273_v11, 4 }
 0x251   : > { %v1300_v43 = vsel %vm1292_vm6, %v1279_v28, %v1282_v30  ;;  %v1276_v34 = vshrl.u32 %v1795_v52, %v1275_v10  ;;  %v1297_v36 = vsel %vm1295_vm7, %v1285_v37, 2102212464  ;;  %v1301_v22 = vsel %vm1295_vm7, %v1288_v38, 920167782 }
 0x252   : > { %v1011_v49 = vshll.u32 %v2350_v51, 30  ;;  %v1305_v44 = vsel %vm1295_vm7, %v1291_v29, 1326507024  ;;  %vm1293_vm8 = vcmp.lt.s32.totalorder %v1273_v11, 2  ;;  %v1302_v35 = vsel %vm1294_vm9, %v1285_v37, %v1301_v22 }
 0x253   : > { %v1304_v47 = vsel %vm1292_vm6, %v1282_v30, %v1285_v37  ;;  %v1303_v17 = vsel %vm1293_vm8, %v1300_v43, %v1302_v35  ;;  %v1306_v53 = vsel %vm1294_vm9, %v1288_v38, %v1305_v44  ;;  %v1308_v62 = vshll.u32 %v1268_v33, 8 }
 0x254   : > { %v2356_v31 = vsub.s32 %v1008_v32, %v1011_v49  ;;  %v1296_v41 = vsel %vm1292_vm6, %v1276_v34, %v1279_v28  ;;  %v1298_v56 = vsel %vm1294_vm9, %v1282_v30, %v1297_v36  ;;  %v1307_v40 = vsel %vm1293_vm8, %v1304_v47, %v1306_v53 }
 0x255   : > { %v2362_v5 = vmul.u32.u64.low %v1308_v62, %v1303_v17  ;;  %v2363_v46 = vmul.u32.u64.high %v1308_v62, %v1303_v17, %v2362_v5  ;;  %v1166_v14 = vadd.s32 1, %v1555_v39  ;;  %v1552_v18 = vmin.u32 %v1118_v26, %v2337_v6 }
 0x256   : > { %v1014_v10 = vsub.s32 0, %v2356_v31  ;;  %v2368_v60 = vmul.u32.u64.low %v1308_v62, %v1307_v40  ;;  %v2369_v25 = vmul.u32.u64.high %v1308_v62, %v1307_v40, %v2368_v60  ;;  %v1299_v12 = vsel %vm1293_vm8, %v1296_v41, %v1298_v56 }
 0x257   : > { %vm1167_vm10 = vcmp.gt.s32.totalorder %v1166_v14, 0  ;;  %v1156_v32 = vand.u32 2147483647, %v2262_v42  ;;  %v1318_v16 = vadd.s32 1, %v2363_v46  ;;  %v1120_v20 = vclz %v1552_v18 }
 0x258   : > { %v1168_v13 = vsel %vm1167_vm10, %v1166_v14, 0  ;;  %v1548_v23 = vmin.u32 %v1014_v10, %v2356_v31  ;;  %v1315_v54 = vmul.u32 %v1308_v62, %v1299_v12  ;;  %vm1317_vm11 = vc.u32 %v2369_v25, %v2362_v5 }
 0x259   : > { %v1170_v15 = vand.u32 31, %v1168_v13  ;;  %v1319_v2 = vsel %vm1317_vm11, %v1318_v16, %v2363_v46  ;;  %v1163_v11 = vand.u32 8388607, %v1156_v32  ;;  %v1553_v9 = vadd.s32 4294967294, %v1120_v20 }
 0x25a   : > { %v1320_v28 = vadd.s32 %v1319_v2, %v1315_v54  ;;  %v1016_v30 = vclz %v1548_v23  ;;  %v1169_v22 = vshrl.u32 %v1168_v13, 5  ;;  %vm1262_vm6 = vcmp.lt.s32.totalorder %v2257_v48, 0 }
 0x25b   : > { %v1171_v8 = vsub.s32 32, %v1170_v15  ;;  %v1164_v33 = vor.u32 8388608, %v1163_v11  ;;  %v1173_v26 = vshll.u32 %v1795_v52, %v1170_v15  ;;  %v1176_v49 = vshll.u32 %v1796_v55, %v1170_v15 }
 0x25c   : > { %v1321_v37 = vadd.s32 536870912, %v1320_v28  ;;  %v1179_v43 = vshll.u32 %v1797_v57, %v1170_v15  ;;  %vm1554_vm13 = vcmp.lt.s32.totalorder %v1553_v9, 0  ;;  %v1549_v36 = vadd.s32 4294967294, %v1016_v30 }
 0x25d   : > { %v1174_v38 = vshrl.u32 %v1796_v55, %v1171_v8  ;;  %v1177_v50 = vshrl.u32 %v1797_v57, %v1171_v8  ;;  %v1180_v29 = vshrl.u32 %v1798_v59, %v1171_v8  ;;  %v1183_v34 = vshrl.u32 %v1799_v61, %v1171_v8 }
 0x25e   : > { %v2384_v39 = vshrl.u32 %v1321_v37, 30  ;;  %v1182_v44 = vshll.u32 %v1798_v59, %v1170_v15  ;;  %v1185_v41 = vshll.u32 %v1799_v61, %v1170_v15  ;;  %v1186_v56 = vshrl.u32 %v1800_v4, %v1171_v8 }
 0x25f   : > { %v1175_v47 = vor.u32 %v1174_v38, %v1173_v26  ;;  %v1178_v17 = vor.u32 %v1177_v50, %v1176_v49  ;;  %v1181_v53 = vor.u32 %v1180_v29, %v1179_v43  ;;  %v1204_v40 = vshll.u32 %v1164_v33, 8 }
 0x260   : > { %v1323_v35 = vshll.u32 %v2384_v39, 30  ;;  %v1184_v62 = vor.u32 %v1183_v34, %v1182_v44  ;;  %v2393_v57 = vsel %vm1554_vm13, 0, %v1553_v9  ;;  %v1187_v46 = vor.u32 %v1186_v56, %v1185_v41 }
 0x261   : > { %vm1188_vm14 = vcmp.lt.s32.totalorder %v1169_v22, 1  ;;  %vm1191_vm15 = vcmp.lt.s32.totalorder %v1169_v22, 4  ;;  %vm1550_vm0 = vcmp.lt.s32.totalorder %v1549_v36, 0  ;;  %v1172_v10 = vshrl.u32 %v1795_v52, %v1171_v8 }
 0x262   : > { %v1324_v55 = vsub.s32 %v1320_v28, %v1323_v35  ;;  %v1193_v59 = vsel %vm1191_vm15, %v1181_v53, 2102212464  ;;  %v1196_v18 = vsel %vm1188_vm14, %v1175_v47, %v1178_v17  ;;  %vm1190_vm1 = vcmp.lt.s32.totalorder %v1169_v22, 3 }
 0x263   : > { %v1197_v60 = vsel %vm1191_vm15, %v1184_v62, 920167782  ;;  %v1200_v12 = vsel %vm1188_vm14, %v1178_v17, %v1181_v53  ;;  %vm1189_vm2 = vcmp.lt.s32.totalorder %v1169_v22, 2  ;;  %v1201_v4 = vsel %vm1191_vm15, %v1187_v46, 1326507024 }
 0x264   : > { %v1326_v14 = vsub.s32 0, %v1324_v55  ;;  %v1198_v61 = vsel %vm1190_vm1, %v1181_v53, %v1197_v60  ;;  %v1192_v16 = vsel %vm1188_vm14, %v1172_v10, %v1175_v47  ;;  %v1194_v15 = vsel %vm1190_vm1, %v1178_v17, %v1193_v59 }
 0x265   : > { %v1199_v20 = vsel %vm1189_vm2, %v1196_v18, %v1198_v61  ;;  %v1202_v23 = vsel %vm1190_vm1, %v1184_v62, %v1201_v4  ;;  %v1019_v9 = vsel %vm1550_vm0, 0, %v1549_v36  ;;  %v1195_v37 = vsel %vm1189_vm2, %v1192_v16, %v1194_v15 }
 0x266   : > { %v1560_v13 = vmin.u32 %v1326_v14, %v1324_v55  ;;  %v1203_v2 = vsel %vm1189_vm2, %v1200_v12, %v1202_v23  ;;  %v2396_v11 = vmul.u32.u64.low %v1204_v40, %v1199_v20  ;;  %v2397_v28 = vmul.u32.u64.high %v1204_v40, %v1199_v20, %v2396_v11 }
 0x267   : > { %v2401_v52 = vmul.u32.u64.low %v1204_v40, %v1203_v2  ;;  %v2402_v8 = vmul.u32.u64.high %v1204_v40, %v1203_v2, %v2401_v52  ;;  %v1128_v38 = vsub.s32 4294967266, %v2393_v57  ;;  %v1024_v50 = vsub.s32 4294967266, %v1019_v9 }
 0x268   : > { %v1328_v54 = vclz %v1560_v13  ;;  %v1214_v33 = vadd.s32 1, %v2397_v28  ;;  %v1211_v29 = vmul.u32 %v1204_v40, %v1195_v37  ;;  %v1316_v49 = vadd.s32 %v2362_v5, %v2369_v25 }
 0x269   : > { %vm1213_vm5 = vc.u32 %v2402_v8, %v2396_v11  ;;  %v1129_v22 = vadd.s32 127, %v1128_v38  ;;  %v1025_v35 = vadd.s32 127, %v1024_v50  ;;  %v1124_v62 = vsub.s32 32, %v2393_v57 }
 0x26a   : > { %v1561_v30 = vadd.s32 4294967294, %v1328_v54  ;;  %v1215_v36 = vsel %vm1213_vm5, %v1214_v33, %v2397_v28  ;;  %v1020_v56 = vsub.s32 32, %v1019_v9  ;;  %v1108_v14 = vadd.s32 %v2296_v7, %v2293_v21 }
 0x26b   : > { %v1216_v44 = vadd.s32 %v1215_v36, %v1211_v29  ;;  %v1130_v5 = vshll.u32 %v1129_v22, 23  ;;  %v1004_v59 = vadd.s32 %v2318_v19, %v2327_v1  ;;  %v1026_v18 = vshll.u32 %v1025_v35, 23 }
 0x26c   : > { %vm1562_vm3 = vcmp.lt.s32.totalorder %v1561_v30, 0  ;;  %v1125_v4 = vshll.u32 %v2337_v6, %v2393_v57  ;;  %v1021_v21 = vshll.u32 %v2356_v31, %v1019_v9  ;;  %v1346_v52 = vsub.s32 4, %v2384_v39 }
 0x26d   : > { %v1331_v26 = vsel %vm1562_vm3, 0, %v1561_v30  ;;  %v1217_v41 = vadd.s32 536870912, %v1216_v44  ;;  %v1022_v12 = vshrl.u32 %v1004_v59, %v1020_v56  ;;  %v1131_v16 = vor.u32 4788187, %v1130_v5 }
 0x26e   : > { %v1332_v43 = vsub.s32 32, %v1331_v26  ;;  %v1336_v34 = vsub.s32 4294967266, %v1331_v26  ;;  %v1333_v47 = vshll.u32 %v1324_v55, %v1331_v26  ;;  %v1126_v55 = vshrl.u32 %v1108_v14, %v1124_v62 }
 0x26f   : > { %v2415_v25 = vshrl.u32 %v1217_v41, 30  ;;  %v1027_v7 = vor.u32 4788187, %v1026_v18  ;;  %v1023_v19 = vor.u32 %v1022_v12, %v1021_v21  ;;  %v1132_v2 = vand.u32 2147483647, %v1131_v16 }
 0x270   : > { %v1334_v17 = vshrl.u32 %v1316_v49, %v1332_v43  ;;  %v1337_v53 = vadd.s32 127, %v1336_v34  ;;  %v1127_v23 = vor.u32 %v1126_v55, %v1125_v4  ;;  %vm2427_vm9 = vcmp.le.f32.partialorder %v1260_v63, 0.7853982 }
 0x271   : > { %v1219_v60 = vshll.u32 %v2415_v25, 30  ;;  %v1028_v30 = vand.u32 2147483647, %v1027_v7  ;;  %v1030_v38 = vcvt.s32.f32 %v1023_v19  ;;  %v1347_v26 = vsel %vm1262_vm6, %v1346_v52, %v2384_v39 }
 0x272   : > { %v1335_v40 = vor.u32 %v1334_v17, %v1333_v47  ;;  %v1338_v46 = vshll.u32 %v1337_v53, 23  ;;  %v1134_v57 = vcvt.s32.f32 %v1127_v23  ;;  %v1349_v49 = vsel %vm2427_vm9, 0, %v1347_v26 }
 0x273   : > { %v1220_v15 = vsub.s32 %v1216_v44, %v1219_v60  ;;  %v1031_v29 = vmul.f32 %v1030_v38, %v1028_v30  ;;  %v1212_v34 = vadd.s32 %v2396_v11, %v2402_v8  ;;  %v1353_v53 = vadd.s32 3, %v1349_v49 }
 0x274   : > { %v1339_v10 = vor.u32 4788187, %v1338_v46  ;;  %v1342_v61 = vcvt.s32.f32 %v1335_v40  ;;  %v1135_v50 = vmul.f32 %v1134_v57, %v1132_v2  ;;  %vm1054_vm8 = vcmp.lt.s32.totalorder %v2247_v0, 0 }
 0x275   : > { %v1222_v54 = vsub.s32 0, %v1220_v15  ;;  %v1032_v44 = vxor.u32 2147483648, %v1031_v29  ;;  %vm950_vm10 = vcmp.lt.s32.totalorder %v2251_v3, 0  ;;  %vm2445_vm11 = vcmp.le.f32.partialorder %v1052_v45, 0.7853982 }
 0x276   : > { %v1340_v13 = vand.u32 2147483647, %v1339_v10  ;;  %v1136_v43 = vxor.u32 2147483648, %v1135_v50  ;;  %v1354_v40 = vand.u32 3, %v1353_v53  ;;  %vm2456_vm13 = vcmp.le.f32.partialorder %v948_v58, 0.7853982 }
 0x277   : > { %v1556_v28 = vmin.u32 %v1222_v54, %v1220_v15  ;;  %v1033_v8 = vsel %vm950_vm10, %v1032_v44, %v1031_v29  ;;  %vm1158_vm14 = vcmp.lt.s32.totalorder %v2262_v42, 0  ;;  %vm1352_vm2 = vweird.f32 %v2257_v48 }
 0x278   : > { %v1343_v20 = vmul.f32 %v1342_v61, %v1340_v13  ;;  %v1137_v39 = vsel %vm1054_vm8, %v1136_v43, %v1135_v50  ;;  %v1036_v10 = vsel %vm2456_vm13, %v2251_v3, %v1033_v8  ;;  %vm1359_vm15 = vcmp.eq.s32.totalorder %v1354_v40, 2 }
 0x279   : > { %v1224_v37 = vclz %v1556_v28  ;;  %v1140_v46 = vsel %vm2445_vm11, %v2247_v0, %v1137_v39  ;;  %vm1356_vm0 = vcmp.eq.s32.totalorder %v1354_v40, 0  ;;  %v1138_v13 = vsub.s32 4, %v2323_v27 }
 0x27a   : > { %v1344_v1 = vxor.u32 2147483648, %v1343_v20  ;;  %vm1355_vm1 = vcmp.lt.s32.totalorder %v1354_v40, 2  ;;  %vm2469_vm3 = vcmp.le.f32.partialorder %v1156_v32, 0.7853982  ;;  %v1034_v23 = vsub.s32 4, %v2350_v51  ;;  %v1369_v40 = vpop.permute.xlu0 %1368 }
 0x27b   : > { %v1557_v33 = vadd.s32 4294967294, %v1224_v37  ;;  %v1371_v8 = vlaneseq }
 0x27c   : > { %v1345_v31 = vsel %vm1262_vm6, %v1344_v1, %v1343_v20  ;;  %v1035_v19 = vsel %vm950_vm10, %v1034_v23, %v2350_v51 }
 0x27d   : > { %v1348_v9 = vsel %vm2427_vm9, %v2257_v48, %v1345_v31  ;;  %vm1558_vm7 = vcmp.lt.s32.totalorder %v1557_v33, 0  ;;  %v1139_v48 = vsel %vm1054_vm8, %v1138_v13, %v2323_v27  ;;  %v1037_v28 = vsel %vm2456_vm13, 0, %v1035_v19 }
 0x27e   : > { %1716 = vcosq.f32 %v1348_v9  ;;  %v1227_v63 = vsel %vm1558_vm7, 0, %v1557_v33  ;;  %v1141_v1 = vsel %vm2445_vm11, 0, %v1139_v48  ;;  %v1041_v31 = vadd.s32 3, %v1037_v28 }
 0x27f   : > { %1718 = vsinq.f32 %v1348_v9  ;;  %v1228_v36 = vsub.s32 32, %v1227_v63  ;;  %v1232_v22 = vsub.s32 4294967266, %v1227_v63  ;;  %v1229_v35 = vshll.u32 %v1220_v15, %v1227_v63 }
 0x280   : > { %1720 = vcosq.f32 %v1140_v46  ;;  %v1242_v15 = vsub.s32 4, %v2415_v25  ;;  %v1145_v52 = vadd.s32 3, %v1141_v1  ;;  %v1042_v50 = vand.u32 3, %v1041_v31 }
 0x281   : > { %v1230_v47 = vshrl.u32 %v1212_v34, %v1228_v36  ;;  %v1233_v17 = vadd.s32 127, %v1232_v22  ;;  %1722 = vsinq.f32 %v1140_v46  ;;  %vm1248_vm13 = vweird.f32 %v2262_v42 }
 0x282   : > { %1724 = vcosq.f32 %v1036_v10  ;;  %v1243_v32 = vsel %vm1158_vm14, %v1242_v15, %v2415_v25  ;;  %v1146_v9 = vand.u32 3, %v1145_v52  ;;  %vm1044_vm8 = vcmp.eq.s32.totalorder %v1042_v50, 0 }
 0x283   : > { %v1231_v62 = vor.u32 %v1230_v47, %v1229_v35  ;;  %v1234_v41 = vshll.u32 %v1233_v17, 23  ;;  %1726 = vsinq.f32 %v1036_v10  ;;  %v1245_v2 = vsel %vm2469_vm3, 0, %v1243_v32 }
 0x284   : > { %v1249_v30 = vadd.s32 3, %v1245_v2  ;;  %vm1147_vm4 = vcmp.lt.s32.totalorder %v1146_v9, 2  ;;  %vm1148_vm5 = vcmp.eq.s32.totalorder %v1146_v9, 0  ;;  %vm1151_vm6 = vcmp.eq.s32.totalorder %v1146_v9, 2 }
 0x285   : > { %v1235_v56 = vor.u32 4788187, %v1234_v41  ;;  %v1238_v59 = vcvt.s32.f32 %v1231_v62  ;;  %vm1047_vm10 = vcmp.eq.s32.totalorder %v1042_v50, 2 }
 0x286   : > { %v1250_v37 = vand.u32 3, %v1249_v30 }
 0x287   : > { %v1236_v45 = vand.u32 2147483647, %v1235_v56 }
 0x288   : > { %vm1255_vm9 = vcmp.eq.s32.totalorder %v1250_v37, 2  ;;  %vm1252_vm7 = vcmp.eq.s32.totalorder %v1250_v37, 0  ;;  %vm1251_vm11 = vcmp.lt.s32.totalorder %v1250_v37, 2 }
 0x289   : > { %v1239_v60 = vmul.f32 %v1238_v59, %v1236_v45 }
 0x28b   : > { %v1717_v14 = vpop.eup %1716  ;;  %v1240_v61 = vxor.u32 2147483648, %v1239_v60 }
 0x28c   : > { %v1719_v18 = vpop.eup %1718  ;;  %v1360_v55 = vxor.u32 2147483648, %v1717_v14 }
 0x28d   : > { %v1357_v12 = vxor.u32 2147483648, %v1719_v18  ;;  %v1241_v7 = vsel %vm1158_vm14, %v1240_v61, %v1239_v60  ;;  %v1721_v27 = vpop.eup %1720  ;;  %vm1043_vm14 = vcmp.lt.s32.totalorder %v1042_v50, 2 }
 0x28e   : > { %v1361_v58 = vsel %vm1359_vm15, %v1360_v55, %v1719_v18  ;;  %v1244_v54 = vsel %vm2469_vm3, %v2262_v42, %v1241_v7  ;;  %v1723_v6 = vpop.eup %1722  ;;  %v1152_v51 = vxor.u32 2147483648, %v1721_v27  ;;  %vm1144_vm15 = vweird.f32 %v2247_v0  ;;  %v1364_v42 = vld [vmem:[%s2550_s5] sm:$0x1] }
 0x28f   : > { %v1358_v4 = vsel %vm1356_vm0, %v1717_v14, %v1357_v12  ;;  %1728 = vcosq.f32 %v1244_v54  ;;  %v1725_v57 = vpop.eup %1724  ;;  %v1149_v38 = vxor.u32 2147483648, %v1723_v6  ;;  %vm1040_vm0 = vweird.f32 %v2251_v3 }
 0x290   : > { %v1362_v16 = vsel %vm1355_vm1, %v1358_v4, %v1361_v58  ;;  %1730 = vsinq.f32 %v1244_v54  ;;  %v1727_v25 = vpop.eup %1726  ;;  %v1048_v29 = vxor.u32 2147483648, %v1725_v57  ;;  %v1153_v36 = vsel %vm1151_vm6, %v1152_v51, %v1723_v6 }
 0x291   : > { %v1363_v20 = vsel %vm1352_vm2, nan, %v1362_v16  ;;  %v1045_v26 = vxor.u32 2147483648, %v1727_v25  ;;  %v1150_v34 = vsel %vm1148_vm5, %v1721_v27, %v1149_v38  ;;  %v1372_v0 = vshrl.u32 %v1371_v8, 7 }
 0x292   : > { %1608 = vmatpush3.msra.mxu0 %v1363_v20  ;;  %v1049_v47 = vsel %vm1047_vm10, %v1048_v29, %v1727_v25  ;;  %v1154_v53 = vsel %vm1147_vm4, %v1150_v34, %v1153_v36 }
 0x293   : > { %1609 = vmatprep.subr.mxu0 %v1801_v24  ;;  %v1046_v35 = vsel %vm1044_vm8, %v1725_v57, %v1045_v26  ;;  %v1155_v41 = vsel %vm1144_vm15, nan, %v1154_v53  ;;  %v1373_v56 = vsub.s32 0, %v1372_v0 }
 0x294   : > { %v1050_v62 = vsel %vm1043_vm14, %v1046_v35, %v1049_v47 }
 0x295   : > { %v1051_v11 = vsel %vm1040_vm0, nan, %v1050_v62  ;;  %v1374_v3 = vrot.slane %v1369_v40, %v1373_v56 }
 0x29c   : > { %v1729_v33 = vpop.eup %1728 }
 0x29d   : > { %v1731_v63 = vpop.eup %1730  ;;  %v1256_v49 = vxor.u32 2147483648, %v1729_v33 }
 0x29e   : > { %v1253_v43 = vxor.u32 2147483648, %v1731_v63 }
 0x29f   : > { %v1257_v22 = vsel %vm1255_vm9, %v1256_v49, %v1731_v63 }
 0x2a0   : > { %v1254_v44 = vsel %vm1252_vm7, %v1729_v33, %v1253_v43 }
 0x2a1   : > { %v1258_v17 = vsel %vm1251_vm11, %v1254_v44, %v1257_v22 }
 0x2a2   : > { %v1259_v39 = vsel %vm1248_vm13, nan, %v1258_v17 }
 0x2a3   : > { %1610 = vmatpush3.msra.mxu0 %v1259_v39 }
 0x2a4   : > { %1611 = vmatprep.subr.mxu0 %v1801_v24 }
 0x2a5   : > { %1612 = vmatpush3.msra.mxu0 %v1155_v41 }
 0x2a6   : > { %1613 = vmatprep.subr.mxu0 %v1801_v24 }
 0x2a7   : > { %1614 = vmatpush3.msra.mxu0 %v1051_v11 }
 0x2a8   : > { %1616 = vmatmul.mubr.msk.f32.vlgmr.msra.gmra.mxu0 %vm850_vm12, %v1364_v42 }
 0x368   : > { %v1444_v46 = vpop.f32.mrf.mxu0 }
 0x369   : > { %v1445_v14 = vadd.f32 %v1444_v46, %v1374_v3 }
 0x36a   : > { %v1617_v24 = vpop.f32.mrf.mxu0 }
 0x36b   : > { %1448 = vst [vmem:[%s270_s25] sm:$0x1] %v1445_v14 }
 0x36c   : > { %1745 = shalt.err (!%p1742_p3)
}
 0x36d   : > { %s1746_s19 = scalar_lea.hbm %s2510_s14, 16  ;;  %s1750_s22 = scalar_lea.hbm %s2552_s7, 48 }
 0x36e   : > { %p1747_p4 = scmp.ne.s32.totalorder %s2510_s14, %s1746_s19  ;;  %p1751_p9 = scmp.lt.s32.totalorder %s2510_s14, %s2552_s7 }
 0x36f   : > { %p1752_p10 = scmp.lt.s32.totalorder %s1750_s22, %s1746_s19 }
 0x370   : > { %p1748_p7 = pnand %p1747_p4, %p1885_p5 }
 0x371   : > { %p1753_p11 = por %p1752_p10, %p1751_p9 }
 0x372   : > { %p1749_p8 = pneg %p1748_p7 }
 0x374   : > { %p1754_p12 = pnand %p1753_p11, %p1749_p8 }
 0x376   : > { %1757 = shalt.err (!%p1754_p12)
}
 0x377   : > { %1650 = dma.vmem_to_hbm [thread:$0]  (%p1885_p5), %s1463_s30, 16, %s2510_s14, %s1450_s15  }
 0x378 PF: > { %p1656_p13 = scmp.ge.s32.totalorder %s1792_s29, 2  ;;  %s1474_s25 = sand.u32 1, %s1780_s26  }
 0x379   : > { %s1475_s9 = scalar_lea.sflag [#allocation4], %s1474_s25 }
 0x37a   : > { %p1653_p0 = pnand %p1656_p13, %p1889_p6 }
 0x37c   : > { %p1654_p1 = pneg %p1653_p0 }
 0x37e   : > { %1775 = dma.done.wait (%p1654_p1), %s1475_s9, 16  }
 0x37f   : > { %1777 = vsyncadd (%p1654_p1), %s1475_s9, 4294967280  ;;  %p19_p2 = scmp.ge.s32.totalorder %s1872_s8, 5   ;;  %s2571_s26 = smov %s1784_s27 }
 0x380   : > { %s2572_s27 = smov %s1788_s28  ;;  %s2573_s28 = smov %s1883_s11 }
 0x381   : > { %s2574_s29 = smov %s1872_s8  ;;  %21 = sbr.rel (!%p19_p2) target bundleno = 6 (0x6), region = 83 }
 0x386   :  { %1479 = vsyncpa [#allocation4], 1 }
 0x387   :  { %1481 = vsyncpa [#allocation4 + $0x1], 1 }

</bundles_post_ra>
